<compile_context>
chip_gen: v6e
topology: v6e:2x2x1
jax: 0.10.0
libtpu: 0.0.40
codegen_flags: <defaults>
</compile_context>

<pallas_src>
import numpy as np
import jax
import jax.numpy as jnp
from jax.experimental import pallas as pl
from jax.experimental.pallas import tpu as pltpu


NEG_INF = -1e9


# ----------------------------- Pallas kernel ------------------------------ #

def _masked_ce_kernel(x_ref, lbl_ref, w_ref, b_ref, out_ref, acc_ref):
    t = pl.program_id(1)

    @pl.when(t == 0)
    def _init():
        acc_ref[...] = jnp.zeros_like(acc_ref)

    # (Vp, C) @ (C, NT) -> (Vp, NT): bf16 operands, f32 accumulation on the MXU.
    logits = jnp.dot(w_ref[...], x_ref[...],
                     preferred_element_type=jnp.float32) + b_ref[...]

    # Numerically stable log-sum-exp over the (padded) vocab axis (axis 0).
    # Padded vocab rows carry bias = -1e9, so exp(logit - m) == 0 there.
    m = jnp.max(logits, axis=0, keepdims=True)                        # (1, NT)
    lse = m + jnp.log(jnp.sum(jnp.exp(logits - m), axis=0, keepdims=True))

    lbl = lbl_ref[...]                                                # (1, NT) int32
    valid = (lbl >= 0).astype(jnp.float32)                            # mask folded into labels
    row = jax.lax.broadcasted_iota(jnp.int32, logits.shape, 0)        # (Vp, NT)
    tgt = jnp.sum(jnp.where(row == lbl, logits, 0.0),
                  axis=0, keepdims=True)                              # (1, NT)

    # Lane-dense accumulation; no cross-lane reduce in the hot loop.
    acc_ref[...] += (lse - tgt) * valid                               # (1, NT)

    # Single cross-lane reduce + store of this batch row's partial sum.
    @pl.when(t == pl.num_programs(1) - 1)
    def _finalize():
        total = jnp.sum(acc_ref[...], axis=1, keepdims=True)          # (1, 1)
        out_ref[0] = jnp.broadcast_to(total, out_ref.shape[1:])


# ------------------------------ host wrapper ------------------------------ #

def _round_up(x, m):
    return ((x + m - 1) // m) * m


def _plan_tiles(t_total, c, vp):
    """Pick the time-tile size and an explicit VMEM limit for this chip."""
    try:
        phys_vmem = pltpu.get_tpu_info().vmem_capacity_bytes
    except Exception:
        phys_vmem = 64 * 1024 * 1024              # v7x per-core size: conservative
    vmem_limit = int(phys_vmem // 2)              # ~half of physical VMEM
    resident = vp * c * 2 + vp * 4                # bf16 weight + f32 bias, single-buffered
    per_t = 4 * c + 16 + 20 * vp                  # x (x2 bufs, bf16) + labels/acc + f32 temps
    nb = (vmem_limit - resident - (4 << 20)) // per_t
    nb = int(max(128, min(4096, (nb // 128) * 128)))
    if t_total <= nb:                             # one tile covers all of T
        nb = _round_up(max(t_total, 1), 8)
    return nb, vmem_limit


@jax.jit
def wav2vec_discrete_bert_loss(quantized, indices, mask, context_output, w, b):
    """CrossEntropy(vocab_proj(context_output[mask]), indices[mask]), mean.

    `quantized` is accepted only for signature parity with the PyTorch module
    (it is only used there to read B, C, T); it does not affect the loss.
    """
    del quantized
    B, C, T = context_output.shape
    V = w.shape[0]
    vp = _round_up(V, 128)                        # minimal 128-lane vocab padding
    nb, vmem_limit = _plan_tiles(T, C, vp)
    t_pad = _round_up(T, nb)
    tpc = t_pad // nb                             # time tiles per batch row

    # bf16 activations consumed directly in (B, C, T) layout — no transpose pass.
    x = context_output.astype(jnp.bfloat16)
    x = jnp.pad(x, ((0, 0), (0, 0), (0, t_pad - T)))

    # Mask folded into labels: invalid / padded positions get label -1.
    # NOTE: masked labels are assumed to lie in [0, V) (as torch CrossEntropyLoss
    # requires); out-of-range labels are not trapped here.
    lbl = jnp.where(mask, indices.astype(jnp.int32), -1)
    lbl = jnp.pad(lbl, ((0, 0), (0, t_pad - T)), constant_values=-1)
    lbl = lbl.reshape(B, 1, t_pad)

    # Weight stays in PyTorch (V, C) layout; padded vocab rows are zero weight
    # with bias -1e9 so they vanish in the log-sum-exp.
    w_p = jnp.pad(w.astype(jnp.bfloat16), ((0, vp - V), (0, 0)))
    b_p = jnp.pad(b.astype(jnp.float32).reshape(V, 1),
                  ((0, vp - V), (0, 0)), constant_values=NEG_INF)

    cost = pl.CostEstimate(
        flops=2 * B * t_pad * C * vp,
        transcendentals=B * t_pad * vp,
        bytes_accessed=(B * C * t_pad * 2 + B * t_pad * 4
                        + vp * C * 2 + vp * 4 + B * 8 * 128 * 4))

    parts = pl.pallas_call(
        _masked_ce_kernel,
        out_shape=jax.ShapeDtypeStruct((B, 8, 128), jnp.float32),
        grid=(B, tpc),
        in_specs=[
            pl.BlockSpec((None, C, nb), lambda bb, tt: (bb, 0, tt)),   # x tile (C, NT)
            pl.BlockSpec((None, 1, nb), lambda bb, tt: (bb, 0, tt)),   # labels (1, NT)
            pl.BlockSpec((vp, C), lambda bb, tt: (0, 0),
                         pipeline_mode=pl.Buffered(1)),                # resident weight
            pl.BlockSpec((vp, 1), lambda bb, tt: (0, 0),
                         pipeline_mode=pl.Buffered(1)),                # resident bias
        ],
        out_specs=pl.BlockSpec((1, 8, 128), lambda bb, tt: (bb, 0, 0)),
        scratch_shapes=[pltpu.VMEM((1, nb), jnp.float32)],
        compiler_params=pltpu.CompilerParams(
            dimension_semantics=("parallel", "arbitrary"),
            vmem_limit_bytes=vmem_limit),
        cost_estimate=cost,
    )(x, lbl, w_p, b_p)

    loss_sum = jnp.sum(parts[:, 0, 0])
    count = jnp.sum(mask.astype(jnp.float32))
    return loss_sum / jnp.maximum(count, 1.0)     # guard against all-False mask


# ------------------------------- reference -------------------------------- #

def _reference_loss(context_output, indices, mask, w, b):
    """float64 numpy reference mirroring the PyTorch module."""
    ctx = np.asarray(context_output, np.float64)
    B, C, T = ctx.shape
    x = ctx.transpose(0, 2, 1).reshape(-1, C)
    m = np.asarray(mask).reshape(-1).astype(bool)
    lbl = np.asarray(indices).reshape(-1)[m]
    pred = x[m]
    logits = pred @ np.asarray(w, np.float64).T + np.asarray(b, np.float64)
    mx = logits.max(-1, keepdims=True)
    lse = mx[:, 0] + np.log(np.exp(logits - mx).sum(-1))
    tgt = logits[np.arange(len(lbl)), lbl]
    return (lse - tgt).mean()


# ---------------------------------- main ----------------------------------- #

if __name__ == "__main__":
    B, C, T = 2, 32, 16
    codebook_size = 320

    key = jax.random.PRNGKey(0)
    k_q, k_ctx, k_idx, k_w, k_b = jax.random.split(key, 5)

    quantized = jax.random.normal(k_q, (B, C, T), dtype=jnp.float32)
    context_output = jax.random.normal(k_ctx, (B, C, T), dtype=jnp.float32)
    indices = jax.random.randint(k_idx, (B, T), 0, codebook_size, dtype=jnp.int32)
    # deterministic mask: every other timestep masked (16 masked positions total)
    mask = jnp.tile(jnp.arange(T) % 2 == 0, (B, 1))

    # nn.Linear(feat_dim, codebook_size) default init: U(-1/sqrt(C), 1/sqrt(C))
    bound = 1.0 / np.sqrt(C)
    w = jax.random.uniform(k_w, (codebook_size, C), jnp.float32, -bound, bound)
    b = jax.random.uniform(k_b, (codebook_size,), jnp.float32, -bound, bound)

    loss = wav2vec_discrete_bert_loss(quantized, indices, mask,
                                      context_output, w, b)
    loss = jax.block_until_ready(loss)

    ref = _reference_loss(context_output, indices, mask, w, b)
    # Tolerance accounts for the bf16 operands feeding the f32-accumulated MXU.
    np.testing.assert_allclose(np.asarray(loss), ref, rtol=1e-2, atol=1e-2)

    print("KERNEL_OK")
</pallas_src>

<mosaic_0001>
module attributes {stable_mosaic.version = 11 : i64} {
  func.func @_masked_ce_kernel(%arg0: i32, %arg1: i32, %arg2: memref<1x32x16xbf16, #tpu.memory_space<vmem>>, %arg3: memref<1x1x16xi32, #tpu.memory_space<vmem>>, %arg4: memref<384x32xbf16, #tpu.memory_space<vmem>>, %arg5: memref<384x1xf32, #tpu.memory_space<vmem>>, %arg6: memref<1x8x128xf32, #tpu.memory_space<vmem>>, %arg7: memref<1x16xf32, #tpu.memory_space<vmem>>) attributes {dimension_semantics = [#tpu.dimension_semantics<parallel>, #tpu.dimension_semantics<arbitrary>], iteration_bounds = array<i64: 2, 1>, scalar_prefetch = 0 : i64, scratch_operands = 1 : i64, tpu.core_type = #tpu.core_type<tc>, window_params = [{transform_indices = @transform_0, window_bounds = array<i64: 1, 32, 16>}, {transform_indices = @transform_1, window_bounds = array<i64: 1, 1, 16>}, {pipeline_mode = #tpu.pipeline_mode<synchronous>, transform_indices = @transform_2, window_bounds = array<i64: 384, 32>}, {pipeline_mode = #tpu.pipeline_mode<synchronous>, transform_indices = @transform_3, window_bounds = array<i64: 384, 1>}, {transform_indices = @transform_4, window_bounds = array<i64: 1, 8, 128>}]} {
    %c0_i32 = arith.constant 0 : i32
    %0 = arith.cmpi eq, %arg1, %c0_i32 : i32
    %1 = arith.extui %0 : i1 to i32
    %c0_i32_0 = arith.constant 0 : i32
    %2 = arith.cmpi ne, %1, %c0_i32_0 : i32
    scf.if %2 {
      %cst_21 = arith.constant 0.000000e+00 : f32
      %40 = vector.broadcast %cst_21 : f32 to vector<1x16xf32>
      %c0_22 = arith.constant 0 : index
      %c0_23 = arith.constant 0 : index
      %41 = vector.load %arg7[%c0_22, %c0_23] : memref<1x16xf32, #tpu.memory_space<vmem>>, vector<1x16xf32>
      tpu.vector_store %arg7[%c0_22, %c0_23], %40 {strides = array<i32>} : memref<1x16xf32, #tpu.memory_space<vmem>>, vector<1x16xf32>,
    } else {
    }
    %c0 = arith.constant 0 : index
    %c0_1 = arith.constant 0 : index
    %3 = vector.load %arg4[%c0, %c0_1] : memref<384x32xbf16, #tpu.memory_space<vmem>>, vector<384x32xbf16>
    %c0_2 = arith.constant 0 : index
    %c0_3 = arith.constant 0 : index
    %c0_4 = arith.constant 0 : index
    %4 = vector.load %arg2[%c0_2, %c0_3, %c0_4] : memref<1x32x16xbf16, #tpu.memory_space<vmem>>, vector<1x32x16xbf16>
    %5 = vector.shape_cast %4 : vector<1x32x16xbf16> to vector<32x16xbf16>
    %cst = arith.constant dense<0.000000e+00> : vector<384x16xf32>
    %6 = tpu.matmul %3, %5, %cst {dimension_numbers = #tpu.dot_dimension_numbers<[1], [0], [0], [1], [0, 0, 1, 1], [], []>} : vector<384x32xbf16>, vector<32x16xbf16>, vector<384x16xf32> -> vector<384x16xf32>
    %c0_5 = arith.constant 0 : index
    %c0_6 = arith.constant 0 : index
    %7 = vector.load %arg5[%c0_5, %c0_6] : memref<384x1xf32, #tpu.memory_space<vmem>>, vector<384x1xf32>
    %8 = vector.broadcast %7 : vector<384x1xf32> to vector<384x16xf32>
    %9 = arith.addf %6, %8 : vector<384x16xf32>
    %cst_7 = arith.constant dense<0xFF800000> : vector<16xf32>
    %10 = vector.multi_reduction <maximumf>, %9, %cst_7 [0] : vector<384x16xf32> to vector<16xf32>
    %11 = vector.shape_cast %10 : vector<16xf32> to vector<1x16xf32>
    %12 = vector.broadcast %11 : vector<1x16xf32> to vector<384x16xf32>
    %13 = arith.subf %9, %12 : vector<384x16xf32>
    %14 = math.exp %13 : vector<384x16xf32>
    %cst_8 = arith.constant dense<0.000000e+00> : vector<16xf32>
    %15 = vector.multi_reduction <add>, %14, %cst_8 [0] : vector<384x16xf32> to vector<16xf32>
    %16 = vector.shape_cast %15 : vector<16xf32> to vector<1x16xf32>
    %17 = math.log %16 : vector<1x16xf32>
    %18 = arith.addf %11, %17 : vector<1x16xf32>
    %c0_9 = arith.constant 0 : index
    %c0_10 = arith.constant 0 : index
    %c0_11 = arith.constant 0 : index
    %19 = vector.load %arg3[%c0_9, %c0_10, %c0_11] : memref<1x1x16xi32, #tpu.memory_space<vmem>>, vector<1x1x16xi32>
    %20 = vector.shape_cast %19 : vector<1x1x16xi32> to vector<1x16xi32>
    %c0_i32_12 = arith.constant 0 : i32
    %21 = vector.broadcast %c0_i32_12 : i32 to vector<1x16xi32>
    %22 = arith.cmpi sge, %20, %21 : vector<1x16xi32>
    %23 = arith.extui %22 : vector<1x16xi1> to vector<1x16xi32>
    %24 = arith.sitofp %23 : vector<1x16xi32> to vector<1x16xf32>
    %25 = tpu.iota {dimensions = array<i32: 0>} : vector<384x16xi32>
    %26 = vector.broadcast %20 : vector<1x16xi32> to vector<384x16xi32>
    %27 = arith.cmpi eq, %25, %26 : vector<384x16xi32>
    %cst_13 = arith.constant 0.000000e+00 : f32
    %28 = vector.broadcast %cst_13 : f32 to vector<384x16xf32>
    %29 = arith.select %27, %9, %28 : vector<384x16xi1>, vector<384x16xf32>
    %cst_14 = arith.constant dense<0.000000e+00> : vector<16xf32>
    %30 = vector.multi_reduction <add>, %29, %cst_14 [0] : vector<384x16xf32> to vector<16xf32>
    %31 = vector.shape_cast %30 : vector<16xf32> to vector<1x16xf32>
    %c0_15 = arith.constant 0 : index
    %c0_16 = arith.constant 0 : index
    %32 = vector.load %arg7[%c0_15, %c0_16] : memref<1x16xf32, #tpu.memory_space<vmem>>, vector<1x16xf32>
    %33 = arith.subf %18, %31 : vector<1x16xf32>
    %34 = arith.mulf %33, %24 : vector<1x16xf32>
    %35 = arith.addf %32, %34 : vector<1x16xf32>
    %c0_17 = arith.constant 0 : index
    %c0_18 = arith.constant 0 : index
    %36 = vector.load %arg7[%c0_17, %c0_18] : memref<1x16xf32, #tpu.memory_space<vmem>>, vector<1x16xf32>
    tpu.vector_store %arg7[%c0_17, %c0_18], %35 {strides = array<i32>} : memref<1x16xf32, #tpu.memory_space<vmem>>, vector<1x16xf32>,
    %c0_i32_19 = arith.constant 0 : i32
    %37 = arith.cmpi eq, %arg1, %c0_i32_19 : i32
    %38 = arith.extui %37 : i1 to i32
    %c0_i32_20 = arith.constant 0 : i32
    %39 = arith.cmpi ne, %38, %c0_i32_20 : i32
    scf.if %39 {
      %c0_21 = arith.constant 0 : index
      %c0_22 = arith.constant 0 : index
      %40 = vector.load %arg7[%c0_21, %c0_22] : memref<1x16xf32, #tpu.memory_space<vmem>>, vector<1x16xf32>
      %cst_23 = arith.constant dense<0.000000e+00> : vector<1xf32>
      %41 = vector.multi_reduction <add>, %40, %cst_23 [1] : vector<1x16xf32> to vector<1xf32>
      %42 = vector.shape_cast %41 : vector<1xf32> to vector<1x1xf32>
      %43 = vector.shape_cast %42 : vector<1x1xf32> to vector<1x1xf32>
      %44 = vector.broadcast %43 : vector<1x1xf32> to vector<8x128xf32>
      %c0_24 = arith.constant 0 : index
      %c0_25 = arith.constant 0 : index
      %c0_26 = arith.constant 0 : index
      %45 = vector.load %arg6[%c0_24, %c0_25, %c0_26] : memref<1x8x128xf32, #tpu.memory_space<vmem>>, vector<1x8x128xf32>
      %46 = vector.shape_cast %45 : vector<1x8x128xf32> to vector<8x128xf32>
      %47 = vector.shape_cast %44 : vector<8x128xf32> to vector<1x8x128xf32>
      tpu.vector_store %arg6[%c0_24, %c0_25, %c0_26], %47 {strides = array<i32>} : memref<1x8x128xf32, #tpu.memory_space<vmem>>, vector<1x8x128xf32>,
    } else {
    }
    return
  }
  func.func @transform_0(%arg0: i32, %arg1: i32) -> (i32, i32, i32) {
    %c0_i32 = arith.constant 0 : i32
    %c0_i32_0 = arith.constant 0 : i32
    return %arg0, %c0_i32, %arg1 : i32, i32, i32
  }
  func.func @transform_1(%arg0: i32, %arg1: i32) -> (i32, i32, i32) {
    %c0_i32 = arith.constant 0 : i32
    %c0_i32_0 = arith.constant 0 : i32
    return %arg0, %c0_i32, %arg1 : i32, i32, i32
  }
  func.func @transform_2(%arg0: i32, %arg1: i32) -> (i32, i32) {
    %c0_i32 = arith.constant 0 : i32
    %c0_i32_0 = arith.constant 0 : i32
    %c0_i32_1 = arith.constant 0 : i32
    return %c0_i32, %c0_i32_0 : i32, i32
  }
  func.func @transform_3(%arg0: i32, %arg1: i32) -> (i32, i32) {
    %c0_i32 = arith.constant 0 : i32
    %c0_i32_0 = arith.constant 0 : i32
    %c0_i32_1 = arith.constant 0 : i32
    return %c0_i32, %c0_i32_0 : i32, i32
  }
  func.func @transform_4(%arg0: i32, %arg1: i32) -> (i32, i32, i32) {
    %c0_i32 = arith.constant 0 : i32
    %c0_i32_0 = arith.constant 0 : i32
    %c0_i32_1 = arith.constant 0 : i32
    return %arg0, %c0_i32, %c0_i32_0 : i32, i32, i32
  }
}

</mosaic_0001>

<bundles_post_ra>
// kernel: wav2vec_discrete_bert_loss.1
= control target key start
LH: loop header
LB: loop body
LE: loop exit
PB: predicated region body
PF: predicated region fallthrough
CT: control target
= control target key end

     0   :  { %s2071_s15 = smov 0   ;;  %s2073_s16 = smov 0   ;;  %s3064_s0 = inlined_call_operand.vmem [shape: bf16[2,32,16], index: 0, kind: input, shape index: {}]   ;;  %s3065_s1 = inlined_call_operand.vmem [shape: s32[2,1,16], index: 1, kind: input, shape index: {}]   ;;  %s3066_s2 = inlined_call_operand.vmem [shape: bf16[384,32], index: 2, kind: input, shape index: {}]   ;;  %s3067_s3 = inlined_call_operand.vmem [shape: f32[384,1], index: 3, kind: input, shape index: {}]   ;;  %s3068_s4 = inlined_call_operand.vmem [shape: f32[2,8,128], index: 4, kind: output, shape index: {}]  }
   0x1   :  { %s2075_s17 = smov 0  }
   0x2 LB: > { %s26_s18 = sadd.s32 1, %s2038_s16  ;;  %p1726_p0 = scmp.ge.s32.totalorder %s2042_s17, 1  ;;  %s2042_s17 = sphi %s2075_s17, %s14_s17   ;;  %s2038_s16 = sphi %s2073_s16, %s3110_s16   ;;  %s2034_s15 = sphi %s2071_s15, %s3109_s15  }
   0x3   : > { %p28_p1 = scmp.ge.s32.totalorder %s26_s18, 2  ;;  %p192_p2 = scmp.lt.s32.totalorder %s2042_s17, 3 }
   0x5   : > { %s3112_s18 = smov (%p28_p1, %s26_s18), 0  ;;  %p193_p3 = pnand %p1726_p0, %p192_p2 }
   0x7   : > { %196 = sbr.rel (%p193_p3) target bundleno = 613 (0x265), region = 36 }
   0xc   : > { %v305_v0 = vld [vmem:[%s3067_s3 + $0x10] sm:$0xff]  ;;  %v303_v1 = vld [vmem:[%s3067_s3] sm:$0xff]  ;;  %p226_p4 = scmp.lt.s32.totalorder %s2034_s15, 1  ;;  %v2044_v2 = vmov 0   ;;  %v306_v3 = vld [vmem:[%s3067_s3 + $0x18] sm:$0xff]  ;;  %vm723_vm0 = vcmask 261120  }
   0xd   : > { %1893 = vset.pattern.permute.xlu1 %v2044_v2  ;;  %1892 = vset.pattern.permute.xlu0 %v2044_v2  ;;  %v304_v4 = vld [vmem:[%s3067_s3 + $0x8] sm:$0xff]  ;;  %v1896_v5 = vld [vmem:[%s3066_s2] sm:$0xff]   ;;  %v310_v11 = vld [vmem:[%s3067_s3 + $0x38] sm:$0xff]  ;;  %vm1021_vm1 = vcmask 130048  }
   0xe   : > { %363 = vperm.xlu1 %1893, %v305_v0   ;;  %353 = vperm.xlu0 %1892, %v303_v1   ;;  %s3114_s15 = smov (!%p226_p4, %s2034_s15), 1  ;;  %v1897_v6 = vld [vmem:[%s3066_s2 + $0x60] sm:$0xff]   ;;  %v308_v7 = vld [vmem:[%s3067_s3 + $0x28] sm:$0xff]  ;;  %v309_v12 = vld [vmem:[%s3067_s3 + $0x30] sm:$0xff] }
   0xf   : > { %s1783_s29 = sshll.u32 %s3114_s15, 4  ;;  %v307_v8 = vld [vmem:[%s3067_s3 + $0x20] sm:$0xff]  ;;  %1814 = vmatprep.mubr.msk.bf16.mxu0 %vm723_vm0, %v1896_v5  ;;  %1838 = vmatprep.mubr.msk.bf16.mxu1 %vm723_vm0, %v1897_v6  ;;  %v1898_v13 = vld [vmem:[%s3066_s2 + $0x8] sm:$0xff]   ;;  %v1900_v15 = vld [vmem:[%s3066_s2 + $0x10] sm:$0xff]   ;;  %s2383_s11 = scalar_lea.vmem %s3065_s1, %s3114_s15 }
  0x10   : > { %s233_s8 = scalar_lea.vmem %s3064_s0, %s1783_s29  ;;  %v1899_v14 = vld [vmem:[%s3066_s2 + $0x68] sm:$0xff]   ;;  %v1901_v16 = vld [vmem:[%s3066_s2 + $0x70] sm:$0xff]   ;;  %v311_v18 = vld [vmem:[%s3067_s3 + $0x40] sm:$0xff]  ;;  %s1729_s12 = sshll.u32 %s3114_s15, 3 }
  0x11   : > { %v1894_v9 = vld [vmem:[%s233_s8 + $0x8] sm:$0xff]   ;;  %v1895_v10 = vld [vmem:[%s233_s8] sm:$0xff]   ;;  %v314_v19 = vld [vmem:[%s3067_s3 + $0x58] sm:$0xff]  ;;  %s243_s19 = scalar_lea.vmem %s3068_s4, %s1729_s12 }
  0x12   : > { %368 = vperm.xlu1 %1893, %v306_v3   ;;  %358 = vperm.xlu0 %1892, %v304_v4   ;;  %v312_v17 = vld [vmem:[%s3067_s3 + $0x48] sm:$0xff]  ;;  %v313_v20 = vld [vmem:[%s3067_s3 + $0x50] sm:$0xff]  ;;  %v1902_v21 = vld [vmem:[%s3066_s2 + $0x18] sm:$0xff]  }
  0x13   : > { %1810 = vmatprep.subr.bf16.mxu0 %v1894_v9  ;;  %1862 = vmatprep.subr.bf16.mxu1 %v1894_v9  ;;  %v1903_v22 = vld [vmem:[%s3066_s2 + $0x78] sm:$0xff]   ;;  %v1904_v23 = vld [vmem:[%s3066_s2 + $0x20] sm:$0xff]   ;;  %v316_v25 = vld [vmem:[%s3067_s3 + $0x68] sm:$0xff] }
  0x14   : > { %1811 = vmatpush3.bf16.msra.mxu0 %v1894_v9  ;;  %1864 = vmatpush3.bf16.msra.mxu1 %v1894_v9  ;;  %v1905_v24 = vld [vmem:[%s3066_s2 + $0x80] sm:$0xff]   ;;  %v318_v27 = vld [vmem:[%s3067_s3 + $0x78] sm:$0xff]  ;;  %v317_v28 = vld [vmem:[%s3067_s3 + $0x70] sm:$0xff] }
  0x15   : > { %1812 = vmatprep.subr.bf16.mxu0 %v1895_v10  ;;  %1863 = vmatprep.subr.bf16.mxu1 %v1895_v10  ;;  %v315_v26 = vld [vmem:[%s3067_s3 + $0x60] sm:$0xff]  ;;  %v1906_v29 = vld [vmem:[%s3066_s2 + $0x28] sm:$0xff]   ;;  %v1908_v31 = vld [vmem:[%s3066_s2 + $0x30] sm:$0xff]  }
  0x16   : > { %378 = vperm.xlu1 %1893, %v308_v7   ;;  %373 = vperm.xlu0 %1892, %v307_v8   ;;  %v1907_v30 = vld [vmem:[%s3066_s2 + $0x88] sm:$0xff]   ;;  %v1909_v32 = vld [vmem:[%s3066_s2 + $0x90] sm:$0xff]   ;;  %v319_v34 = vld [vmem:[%s3067_s3 + $0x80] sm:$0xff] }
  0x17   : > { %v320_v33 = vld [vmem:[%s3067_s3 + $0x88] sm:$0xff]  ;;  %v322_v35 = vld [vmem:[%s3067_s3 + $0x98] sm:$0xff]  ;;  %v321_v36 = vld [vmem:[%s3067_s3 + $0x90] sm:$0xff] }
  0x18   : > { %1813 = vmatpush3.bf16.msra.mxu0 %v1895_v10  ;;  %1865 = vmatpush3.bf16.msra.mxu1 %v1895_v10  ;;  %v1910_v37 = vld [vmem:[%s3066_s2 + $0x38] sm:$0xff]   ;;  %v1912_v39 = vld [vmem:[%s3066_s2 + $0x40] sm:$0xff]   ;;  %v324_v41 = vld [vmem:[%s3067_s3 + $0xa8] sm:$0xff] }
  0x19   : > { %v1911_v38 = vld [vmem:[%s3066_s2 + $0x98] sm:$0xff]   ;;  %v1913_v40 = vld [vmem:[%s3066_s2 + $0xa0] sm:$0xff]   ;;  %v325_v44 = vld [vmem:[%s3067_s3 + $0xb0] sm:$0xff] }
  0x1a   : > { %388 = vperm.xlu1 %1893, %v310_v11   ;;  %383 = vperm.xlu0 %1892, %v309_v12   ;;  %v323_v42 = vld [vmem:[%s3067_s3 + $0xa0] sm:$0xff]  ;;  %v326_v43 = vld [vmem:[%s3067_s3 + $0xb8] sm:$0xff]  ;;  %v1914_v45 = vld [vmem:[%s3066_s2 + $0x48] sm:$0xff]  }
  0x1b   : > { %1815 = vmatmul.mubr.msk.bf16.vlgmr.msra.gmra.mxu0 %vm723_vm0, %v1898_v13  ;;  %1839 = vmatmul.mubr.msk.bf16.vlgmr.msra.gmra.mxu1 %vm723_vm0, %v1899_v14  ;;  %v1915_v46 = vld [vmem:[%s3066_s2 + $0xa8] sm:$0xff]   ;;  %v1916_v47 = vld [vmem:[%s3066_s2 + $0x50] sm:$0xff]   ;;  %v327_v50 = vld [vmem:[%s3067_s3 + $0xc0] sm:$0xff] }
  0x1c   : > { %1818 = vmatprep.mubr.msk.bf16.mxu0 %vm723_vm0, %v1900_v15  ;;  %1842 = vmatprep.mubr.msk.bf16.mxu1 %vm723_vm0, %v1901_v16  ;;  %v1917_v48 = vld [vmem:[%s3066_s2 + $0xb0] sm:$0xff]   ;;  %v328_v49 = vld [vmem:[%s3067_s3 + $0xc8] sm:$0xff]  ;;  %v330_v51 = vld [vmem:[%s3067_s3 + $0xd8] sm:$0xff] }
  0x1d   : > { %v329_v52 = vld [vmem:[%s3067_s3 + $0xd0] sm:$0xff]  ;;  %v1918_v53 = vld [vmem:[%s3066_s2 + $0x58] sm:$0xff]   ;;  %v332_v55 = vld [vmem:[%s3067_s3 + $0xe8] sm:$0xff] }
  0x1e   : > { %398 = vperm.xlu1 %1893, %v312_v17   ;;  %393 = vperm.xlu0 %1892, %v311_v18   ;;  %v1919_v54 = vld [vmem:[%s3066_s2 + $0xb8] sm:$0xff]   ;;  %v331_v56 = vld [vmem:[%s3067_s3 + $0xe0] sm:$0xff]  ;;  %v333_v58 = vld [vmem:[%s3067_s3 + $0xf0] sm:$0xff] }
  0x1f   : > { %v334_v57 = vld [vmem:[%s3067_s3 + $0xf8] sm:$0xff]  ;;  %v336_v59 = vld [vmem:[%s3067_s3 + $0x108] sm:$0xff]  ;;  %v335_v60 = vld [vmem:[%s3067_s3 + $0x100] sm:$0xff] }
  0x20   : > { %v338_v61 = vld [vmem:[%s3067_s3 + $0x118] sm:$0xff]  ;;  %v337_v62 = vld [vmem:[%s3067_s3 + $0x110] sm:$0xff]  ;;  %v340_v63 = vld [vmem:[%s3067_s3 + $0x128] sm:$0xff] }
  0x21   : > { %v339_v0 = vld [vmem:[%s3067_s3 + $0x120] sm:$0xff]  ;;  %v342_v1 = vld [vmem:[%s3067_s3 + $0x138] sm:$0xff]  ;;  %v341_v2 = vld [vmem:[%s3067_s3 + $0x130] sm:$0xff] }
  0x22   : > { %408 = vperm.xlu1 %1893, %v314_v19   ;;  %403 = vperm.xlu0 %1892, %v313_v20   ;;  %v344_v3 = vld [vmem:[%s3067_s3 + $0x148] sm:$0xff]  ;;  %v343_v4 = vld [vmem:[%s3067_s3 + $0x140] sm:$0xff]  ;;  %v346_v5 = vld [vmem:[%s3067_s3 + $0x158] sm:$0xff] }
  0x23   : > { %1819 = vmatmul.mubr.msk.bf16.gmra.mxu0 %vm723_vm0, %v1902_v21  ;;  %1843 = vmatmul.mubr.msk.bf16.gmra.mxu1 %vm723_vm0, %v1903_v22  ;;  %v345_v6 = vld [vmem:[%s3067_s3 + $0x150] sm:$0xff]  ;;  %v348_v7 = vld [vmem:[%s3067_s3 + $0x168] sm:$0xff]  ;;  %v347_v8 = vld [vmem:[%s3067_s3 + $0x160] sm:$0xff] }
  0x24   : > { %1822 = vmatprep.mubr.msk.bf16.mxu0 %vm723_vm0, %v1904_v23  ;;  %1846 = vmatprep.mubr.msk.bf16.mxu1 %vm723_vm0, %v1905_v24  ;;  %v350_v9 = vld [vmem:[%s3067_s3 + $0x178] sm:$0xff]  ;;  %v349_v10 = vld [vmem:[%s3067_s3 + $0x170] sm:$0xff] }
  0x26   : > { %418 = vperm.xlu1 %1893, %v316_v25   ;;  %413 = vperm.xlu0 %1892, %v315_v26  }
  0x2a   : > { %428 = vperm.xlu1 %1893, %v318_v27   ;;  %423 = vperm.xlu0 %1892, %v317_v28  }
  0x2b   : > { %1823 = vmatmul.mubr.msk.bf16.gmra.mxu0 %vm723_vm0, %v1906_v29  ;;  %1847 = vmatmul.mubr.msk.bf16.gmra.mxu1 %vm723_vm0, %v1907_v30 }
  0x2c   : > { %1826 = vmatprep.mubr.msk.bf16.mxu0 %vm723_vm0, %v1908_v31  ;;  %1850 = vmatprep.mubr.msk.bf16.mxu1 %vm723_vm0, %v1909_v32 }
  0x2e   : > { %438 = vperm.xlu1 %1893, %v320_v33   ;;  %433 = vperm.xlu0 %1892, %v319_v34  }
  0x32   : > { %448 = vperm.xlu1 %1893, %v322_v35   ;;  %443 = vperm.xlu0 %1892, %v321_v36   ;;  %v1375_v35 = vlaneseq }
  0x33   : > { %1827 = vmatmul.mubr.msk.bf16.gmra.mxu0 %vm723_vm0, %v1910_v37  ;;  %1851 = vmatmul.mubr.msk.bf16.gmra.mxu1 %vm723_vm0, %v1911_v38 }
  0x34   : > { %1830 = vmatprep.mubr.msk.bf16.mxu0 %vm723_vm0, %v1912_v39  ;;  %1854 = vmatprep.mubr.msk.bf16.mxu1 %vm723_vm0, %v1913_v40  ;;  %v2377_v37 = vshrl.u32 %v1375_v35, 7 }
  0x36   : > { %458 = vperm.xlu1 %1893, %v324_v41   ;;  %453 = vperm.xlu0 %1892, %v323_v42   ;;  %3083 = vst [vmem:[#allocation3_spill] sm:$0xff] %v2377_v37  ;;  %v2387_v42 = vld [vmem:[%s2383_s11] ss:$0 sm:$0xff] }
  0x37   : > { %vm1428_vm2 = vcmp.eq.s32.totalorder %v2377_v37, %v2387_v42 }
  0x3a   : > { %468 = vperm.xlu1 %1893, %v326_v43   ;;  %463 = vperm.xlu0 %1892, %v325_v44  }
  0x3b   : > { %1831 = vmatmul.mubr.msk.bf16.gmra.mxu0 %vm723_vm0, %v1914_v45  ;;  %1855 = vmatmul.mubr.msk.bf16.gmra.mxu1 %vm723_vm0, %v1915_v46 }
  0x3c   : > { %1834 = vmatprep.mubr.msk.bf16.mxu0 %vm723_vm0, %v1916_v47  ;;  %1858 = vmatprep.mubr.msk.bf16.mxu1 %vm723_vm0, %v1917_v48 }
  0x3e   : > { %478 = vperm.xlu1 %1893, %v328_v49   ;;  %473 = vperm.xlu0 %1892, %v327_v50   ;;  %v1378_v50 = vadd.s32 16, %v2377_v37 }
  0x40   : > { %vm1430_vm3 = vcmp.eq.s32.totalorder %v1378_v50, %v2387_v42 }
  0x42   : > { %488 = vperm.xlu1 %1893, %v330_v51   ;;  %483 = vperm.xlu0 %1892, %v329_v52  }
  0x43   : > { %1835 = vmatmul.mubr.msk.bf16.gmra.mxu0 %vm723_vm0, %v1918_v53  ;;  %1859 = vmatmul.mubr.msk.bf16.gmra.mxu1 %vm723_vm0, %v1919_v54 }
  0x46   : > { %498 = vperm.xlu1 %1893, %v332_v55   ;;  %493 = vperm.xlu0 %1892, %v331_v56   ;;  %v1377_v55 = vadd.s32 8, %v2377_v37 }
  0x48   : > { %vm1429_vm4 = vcmp.eq.s32.totalorder %v1377_v55, %v2387_v42 }
  0x4a   : > { %508 = vperm.xlu1 %1893, %v334_v57   ;;  %503 = vperm.xlu0 %1892, %v333_v58  }
  0x4e   : > { %518 = vperm.xlu1 %1893, %v336_v59   ;;  %513 = vperm.xlu0 %1892, %v335_v60   ;;  %v1379_v60 = vadd.s32 24, %v2377_v37 }
  0x50   : > { %vm1431_vm5 = vcmp.eq.s32.totalorder %v1379_v60, %v2387_v42 }
  0x52   : > { %528 = vperm.xlu1 %1893, %v338_v61   ;;  %523 = vperm.xlu0 %1892, %v337_v62  }
  0x56   : > { %538 = vperm.xlu1 %1893, %v340_v63   ;;  %533 = vperm.xlu0 %1892, %v339_v0  }
  0x5a   : > { %548 = vperm.xlu1 %1893, %v342_v1   ;;  %543 = vperm.xlu0 %1892, %v341_v2  }
  0x5e   : > { %558 = vperm.xlu1 %1893, %v344_v3   ;;  %553 = vperm.xlu0 %1892, %v343_v4   ;;  %v1380_v4 = vadd.s32 32, %v2377_v37 }
  0x60   : > { %vm1432_vm6 = vcmp.eq.s32.totalorder %v1380_v4, %v2387_v42 }
  0x62   : > { %568 = vperm.xlu1 %1893, %v346_v5   ;;  %563 = vperm.xlu0 %1892, %v345_v6  }
  0x66   : > { %578 = vperm.xlu1 %1893, %v348_v7   ;;  %573 = vperm.xlu0 %1892, %v347_v8  }
  0x6a   : > { %588 = vperm.xlu1 %1893, %v350_v9   ;;  %583 = vperm.xlu0 %1892, %v349_v10  }
  0x89   : > { %v354_v11 = vpop.permute.xlu0 %353  ;;  %v364_v12 = vpop.permute.xlu1 %363 }
  0x8d   : > { %v2335_v13 = vpop.permute.xlu0 %358  ;;  %v369_v14 = vpop.permute.xlu1 %368 }
  0x91   : > { %v2337_v15 = vpop.permute.xlu0 %373  ;;  %v2339_v16 = vpop.permute.xlu1 %378 }
  0x95   : > { %v2341_v17 = vpop.permute.xlu0 %383  ;;  %v2343_v18 = vpop.permute.xlu1 %388 }
  0x99   : > { %v2345_v19 = vpop.permute.xlu0 %393  ;;  %v2347_v20 = vpop.permute.xlu1 %398 }
  0x9d   : > { %v2349_v21 = vpop.permute.xlu0 %403  ;;  %v2351_v22 = vpop.permute.xlu1 %408 }
  0xa1   : > { %v2353_v23 = vpop.permute.xlu0 %413  ;;  %v2355_v24 = vpop.permute.xlu1 %418 }
  0xa5   : > { %v2357_v25 = vpop.permute.xlu0 %423  ;;  %v2359_v26 = vpop.permute.xlu1 %428 }
  0xa9   : > { %v2361_v27 = vpop.permute.xlu0 %433  ;;  %v2363_v28 = vpop.permute.xlu1 %438 }
  0xad   : > { %v2365_v29 = vpop.permute.xlu0 %443  ;;  %v2367_v30 = vpop.permute.xlu1 %448 }
  0xb1   : > { %v2369_v31 = vpop.permute.xlu0 %453  ;;  %v2371_v32 = vpop.permute.xlu1 %458 }
  0xb5   : > { %v2373_v33 = vpop.permute.xlu0 %463  ;;  %v2375_v34 = vpop.permute.xlu1 %468 }
  0xb9   : > { %v474_v36 = vpop.permute.xlu0 %473  ;;  %v479_v38 = vpop.permute.xlu1 %478 }
  0xbd   : > { %v484_v39 = vpop.permute.xlu0 %483  ;;  %v489_v48 = vpop.permute.xlu1 %488 }
  0xc1   : > { %v494_v56 = vpop.permute.xlu0 %493  ;;  %v2415_v5 = vpop.permute.xlu1 %498 }
  0xdb   : > { %v1816_v41 = vpop.f32.mrf.mxu0  ;;  %v1840_v43 = vpop.f32.mrf.mxu1 }
  0xdc   : > { %v2389_v44 = vadd.f32 %v1816_v41, %v364_v12  ;;  %v2391_v45 = vadd.f32 %v1840_v43, %v484_v39 }
  0xdd   : > { %v830_v46 = vpop.f32.mrf.mxu0  ;;  %v926_v47 = vpop.f32.mrf.mxu1 }
  0xde   : > { %3084 = vst [vmem:[#allocation4_spill] sm:$0xff] %v2389_v44  ;;  %v1024_v49 = vsel %vm1021_vm1, %v2389_v44, -inf  ;;  %v1070_v51 = vsel %vm1021_vm1, %v2391_v45, -inf  ;;  %v2399_v57 = vadd.f32 %v830_v46, %v354_v11  ;;  %v2401_v58 = vadd.f32 %v926_v47, %v474_v36  ;;  %v504_v36 = vpop.permute.xlu0 %503 }
  0xdf   : > { %v1031_v52 = vmax.f32 %v1024_v49, %v1070_v51  ;;  %v1817_v53 = vpop.f32.mrf.mxu0  ;;  %v1841_v54 = vpop.f32.mrf.mxu1  ;;  %v1382_v11 = vadd.s32 48, %v2377_v37  ;;  %v1478_v39 = vsel %vm1430_vm3, %v2389_v44, 0.0 }
  0xe0   : > { %v2403_v59 = vadd.f32 %v1841_v54, %v489_v48  ;;  %v1066_v63 = vsel %vm1021_vm1, %v2401_v58, -inf  ;;  %v1476_v6 = vsel %vm1428_vm2, %v2399_v57, 0.0  ;;  %v2418_v7 = vadd.f32 %v1817_v53, %v369_v14 }
  0xe1   : > { %v833_v61 = vpop.f32.mrf.mxu0  ;;  %v929_v62 = vpop.f32.mrf.mxu1  ;;  %v1029_v0 = vmax.f32 %v1066_v63, %v1031_v52  ;;  %v1524_v41 = vsel %vm1021_vm1, %v1476_v6, 0.0  ;;  %vm1434_vm7 = vcmp.eq.s32.totalorder %v1382_v11, %v2387_v42  ;;  %v1383_v6 = vadd.s32 56, %v2377_v37 }
  0xe2   : > { %v1072_v1 = vsel %vm1021_vm1, %v2403_v59, -inf  ;;  %v2421_v8 = vadd.f32 %v833_v61, %v2335_v13  ;;  %v2423_v9 = vadd.f32 %v929_v62, %v479_v38  ;;  %v1479_v49 = vsel %vm1431_vm5, %v2418_v7, 0.0  ;;  %v509_v63 = vpop.permute.xlu1 %508 }
  0xe3   : > { %v1820_v2 = vpop.f32.mrf.mxu0  ;;  %v1844_v3 = vpop.f32.mrf.mxu1  ;;  %v1039_v10 = vmax.f32 %v1072_v1, %v1029_v0  ;;  %v1381_v61 = vadd.s32 40, %v2377_v37  ;;  %vm1435_vm9 = vcmp.eq.s32.totalorder %v1383_v6, %v2387_v42 }
  0xe4   : > { %3085 = vst [vmem:[#allocation5_spill] sm:$0xff] %v2421_v8  ;;  %v1023_v14 = vsel %vm1021_vm1, %v2421_v8, -inf  ;;  %v1477_v13 = vsel %vm1429_vm4, %v2421_v8, 0.0  ;;  %v2436_v38 = vadd.f32 %v1820_v2, %v2341_v17  ;;  %v1068_v51 = vsel %vm1021_vm1, %v2423_v9, -inf }
  0xe5   : > { %v846_v12 = vpop.f32.mrf.mxu0  ;;  %v942_v35 = vpop.f32.mrf.mxu1  ;;  %v1037_v43 = vmax.f32 %v1023_v14, %v1039_v10  ;;  %v1525_v46 = vsel %vm1021_vm1, %v1477_v13, 0.0  ;;  %v2446_v52 = vadd.f32 %v1844_v3, %v504_v36  ;;  %v1527_v17 = vsel %vm1021_vm1, %v1478_v39, 0.0 }
  0xe6   : > { %3086 = vst [vmem:[#allocation6_spill] sm:$0xff] %v2436_v38  ;;  %v1526_v50 = vadd.f32 %v1525_v46, %v1524_v41  ;;  %v2450_v54 = vadd.f32 %v846_v12, %v2337_v15  ;;  %v1030_v60 = vsel %vm1021_vm1, %v2436_v38, -inf  ;;  %v2456_v1 = vadd.f32 %v942_v35, %v494_v56  ;;  %v514_v36 = vpop.permute.xlu0 %513 }
  0xe7   : > { %v1821_v47 = vpop.f32.mrf.mxu0  ;;  %v1845_v48 = vpop.f32.mrf.mxu1  ;;  %v1047_v53 = vmax.f32 %v1068_v51, %v1037_v43  ;;  %v1529_v2 = vsel %vm1021_vm1, %v1479_v49, 0.0  ;;  %v1078_v39 = vsel %vm1021_vm1, %v2446_v52, -inf  ;;  %vm1433_vm8 = vcmp.eq.s32.totalorder %v1381_v61, %v2387_v42 }
  0xe8   : > { %v1528_v0 = vadd.f32 %v1527_v17, %v1526_v50  ;;  %v1480_v15 = vsel %vm1432_vm6, %v2450_v54, 0.0  ;;  %v2465_v13 = vadd.f32 %v1845_v48, %v509_v63  ;;  %v1384_v43 = vadd.s32 64, %v2377_v37  ;;  %v519_v17 = vpop.permute.xlu1 %518 }
  0xe9   : > { %v849_v55 = vpop.f32.mrf.mxu0  ;;  %v945_v62 = vpop.f32.mrf.mxu1  ;;  %v1045_v3 = vmax.f32 %v1030_v60, %v1047_v53  ;;  %v1531_v41 = vsel %vm1021_vm1, %v1480_v15, 0.0  ;;  %v1074_v50 = vsel %vm1021_vm1, %v2456_v1, -inf  ;;  %v2476_v51 = vadd.f32 %v1821_v47, %v2343_v18 }
  0xea   : > { %v1530_v14 = vadd.f32 %v1529_v2, %v1528_v0  ;;  %v2468_v56 = vadd.f32 %v849_v55, %v2339_v16  ;;  %v1482_v53 = vsel %vm1434_vm7, %v2436_v38, 0.0  ;;  %v1080_v55 = vsel %vm1021_vm1, %v2465_v13, -inf  ;;  %v524_v11 = vpop.permute.xlu0 %523 }
  0xeb   : > { %v1824_v10 = vpop.f32.mrf.mxu0  ;;  %v1848_v12 = vpop.f32.mrf.mxu1  ;;  %v1055_v35 = vmax.f32 %v1078_v39, %v1045_v3  ;;  %3088 = vst [vmem:[#allocation8_spill] sm:$0xff] %v2476_v51  ;;  %v2486_v63 = vadd.f32 %v945_v62, %v2415_v5  ;;  %vm1436_vm10 = vcmp.eq.s32.totalorder %v1384_v43, %v2387_v42  ;;  %v1483_v3 = vsel %vm1435_vm9, %v2476_v51, 0.0 }
  0xec   : > { %3087 = vst [vmem:[#allocation7_spill] sm:$0xff] %v2468_v56  ;;  %v1532_v49 = vadd.f32 %v1531_v41, %v1530_v14  ;;  %v1481_v61 = vsel %vm1433_vm8, %v2468_v56, 0.0  ;;  %v1028_v15 = vsel %vm1021_vm1, %v2468_v56, -inf  ;;  %v2497_v5 = vadd.f32 %v1824_v10, %v2349_v21 }
  0xed   : > { %v862_v4 = vpop.f32.mrf.mxu0  ;;  %v958_v46 = vpop.f32.mrf.mxu1  ;;  %v1053_v48 = vmax.f32 %v1074_v50, %v1055_v35  ;;  %v1533_v18 = vsel %vm1021_vm1, %v1481_v61, 0.0  ;;  %v1535_v62 = vsel %vm1021_vm1, %v1482_v53, 0.0  ;;  %v1076_v41 = vsel %vm1021_vm1, %v2486_v63, -inf }
  0xee   : > { %v2490_v47 = vadd.f32 %v862_v4, %v2345_v19  ;;  %v1534_v6 = vadd.f32 %v1533_v18, %v1532_v49  ;;  %3090 = vst [vmem:[#allocation10_spill] sm:$0xff] %v2497_v5  ;;  %v1386_v19 = vadd.s32 80, %v2377_v37  ;;  %v2503_v4 = vadd.f32 %v1848_v12, %v524_v11  ;;  %v529_v61 = vpop.permute.xlu1 %528 }
  0xef   : > { %v1825_v16 = vpop.f32.mrf.mxu0  ;;  %v1063_v0 = vmax.f32 %v1080_v55, %v1053_v48  ;;  %v1849_v60 = vpop.f32.mrf.mxu1  ;;  %v1385_v50 = vadd.s32 72, %v2377_v37  ;;  %v1537_v48 = vsel %vm1021_vm1, %v1483_v3, 0.0  ;;  %v1387_v10 = vadd.s32 88, %v2377_v37 }
  0xf0   : > { %3089 = vst [vmem:[#allocation9_spill] sm:$0xff] %v2490_v47  ;;  %v1536_v35 = vadd.f32 %v1535_v62, %v1534_v6  ;;  %v1484_v21 = vsel %vm1436_vm10, %v2490_v47, 0.0  ;;  %v2513_v12 = vadd.f32 %v958_v46, %v514_v36  ;;  %v1388_v11 = vadd.s32 96, %v2377_v37  ;;  %v534_v6 = vpop.permute.xlu0 %533 }
  0xf1   : > { %v865_v2 = vpop.f32.mrf.mxu0  ;;  %v1071_v39 = vmax.f32 %v1063_v0, %v1028_v15  ;;  %v961_v53 = vpop.f32.mrf.mxu1  ;;  %v1038_v0 = vsel %vm1021_vm1, %v2497_v5, -inf  ;;  %vm1438_vm11 = vcmp.eq.s32.totalorder %v1386_v19, %v2387_v42  ;;  %v1086_v62 = vsel %vm1021_vm1, %v2503_v4, -inf }
  0xf2   : > { %v1538_v18 = vadd.f32 %v1537_v48, %v1536_v35  ;;  %v2518_v3 = vadd.f32 %v865_v2, %v2347_v20  ;;  %vm1437_vm12 = vcmp.eq.s32.totalorder %v1385_v50, %v2387_v42  ;;  %v2527_v36 = vadd.s32 192, %v2377_v37 }
  0xf3   : > { %v1828_v14 = vpop.f32.mrf.mxu0  ;;  %v1079_v49 = vmax.f32 %v1071_v39, %v1076_v41  ;;  %v1539_v39 = vsel %vm1021_vm1, %v1484_v21, 0.0  ;;  %v2523_v41 = vadd.f32 %v1849_v60, %v529_v61  ;;  %v2530_v48 = vadd.f32 %v1825_v16, %v2351_v22  ;;  %v1852_v20 = vpop.f32.mrf.mxu1 }
  0xf4   : > { %3091 = vst [vmem:[#allocation11_spill] sm:$0xff] %v2518_v3  ;;  %v1540_v35 = vadd.f32 %v1539_v39, %v1538_v18  ;;  %vm1439_vm13 = vcmp.eq.s32.totalorder %v1387_v10, %v2387_v42  ;;  %v1390_v60 = vadd.s32 112, %v2377_v37  ;;  %vm1440_vm14 = vcmp.eq.s32.totalorder %v1388_v11, %v2387_v42  ;;  %v544_v38 = vpop.permute.xlu0 %543 }
  0xf5   : > { %v878_v55 = vpop.f32.mrf.mxu0  ;;  %v1087_v15 = vmax.f32 %v1079_v49, %v1038_v0  ;;  %v1082_v49 = vsel %vm1021_vm1, %v2513_v12, -inf  ;;  %v1486_v50 = vsel %vm1438_vm11, %v2497_v5, 0.0  ;;  %v1485_v61 = vsel %vm1437_vm12, %v2518_v3, 0.0  ;;  %v2546_v0 = vpop.permute.xlu1 %538 }
  0xf6   : > { %v2542_v22 = vadd.s32 120, %v2377_v37  ;;  %v1088_v10 = vsel %vm1021_vm1, %v2523_v41, -inf  ;;  %v1541_v18 = vsel %vm1021_vm1, %v1485_v61, 0.0  ;;  %v1389_v19 = vadd.s32 104, %v2377_v37  ;;  %v974_v40 = vpop.f32.mrf.mxu1 }
  0xf7   : > { %v1829_v43 = vpop.f32.mrf.mxu0  ;;  %v1095_v46 = vmax.f32 %v1087_v15, %v1086_v62  ;;  %v2551_v15 = vadd.f32 %v961_v53, %v519_v17  ;;  %v1487_v62 = vsel %vm1439_vm13, %v2530_v48, 0.0  ;;  %v1543_v56 = vsel %vm1021_vm1, %v1486_v50, 0.0 }
  0xf8   : > { %v1036_v44 = vsel %vm1021_vm1, %v2518_v3, -inf  ;;  %v2562_v17 = vadd.f32 %v1828_v14, %v2357_v25  ;;  %v1392_v53 = vadd.s32 128, %v2377_v37  ;;  %vm1442_vm15 = vcmp.eq.s32.totalorder %v1390_v60, %v2387_v42  ;;  %v1853_v14 = vpop.f32.mrf.mxu1 }
  0xf9   : > { %v881_v2 = vpop.f32.mrf.mxu0  ;;  %v1103_v21 = vmax.f32 %v1095_v46, %v1082_v49  ;;  %v1542_v46 = vadd.f32 %v1541_v18, %v1540_v35  ;;  %v2556_v49 = vadd.f32 %v878_v55, %v2353_v23  ;;  %v2566_v35 = vadd.f32 %v1852_v20, %v544_v38 }
  0xfa   : > { %3092 = vst [vmem:[#allocation12_spill] sm:$0xff] %v2562_v17  ;;  %v1545_v55 = vsel %vm1021_vm1, %v1487_v62, 0.0  ;;  %v1084_v50 = vsel %vm1021_vm1, %v2551_v15, -inf  ;;  %vm1443_vm0 = vcmp.eq.s32.totalorder %v2542_v22, %v2387_v42  ;;  %vm1441_vm2 = vcmp.eq.s32.totalorder %v1389_v19, %v2387_v42 }
  0xfb   : > { %v2544_v16 = vpop.f32.mrf.mxu0  ;;  %v1111_v39 = vmax.f32 %v1103_v21, %v1088_v10  ;;  %v1544_v8 = vadd.f32 %v1543_v56, %v1542_v46  ;;  %3093 = vst [vmem:[#allocation13_spill] sm:$0xff] %v2566_v35  ;;  %v1488_v25 = vsel %vm1440_vm14, %v2556_v49, 0.0  ;;  %v2580_v38 = vadd.s32 144, %v2377_v37  ;;  %v549_v10 = vpop.permute.xlu1 %548 }
  0xfc   : > { %v1046_v20 = vsel %vm1021_vm1, %v2562_v17, -inf  ;;  %v2584_v21 = vadd.f32 %v974_v40, %v534_v6  ;;  %vm1444_vm3 = vcmp.eq.s32.totalorder %v1392_v53, %v2387_v42  ;;  %v2588_v11 = vadd.s32 136, %v2377_v37 }
  0xfd   : > { %v894_v5 = vpop.f32.mrf.mxu0  ;;  %v1059_v61 = vmax.f32 %v1036_v44, %v1111_v39  ;;  %v1546_v56 = vadd.f32 %v1545_v55, %v1544_v8  ;;  %v1094_v8 = vsel %vm1021_vm1, %v2566_v35, -inf  ;;  %v1547_v62 = vsel %vm1021_vm1, %v1488_v25, 0.0  ;;  %v977_v35 = vpop.f32.mrf.mxu1 }
  0xfe   : > { %v2594_v39 = vadd.s32 152, %v2377_v37  ;;  %v2597_v40 = vadd.f32 %v1829_v43, %v2359_v26  ;;  %v2599_v6 = vadd.f32 %v1853_v14, %v549_v10  ;;  %v2602_v55 = vadd.f32 %v881_v2, %v2355_v24 }
  0xff   : > { %v2568_v23 = vpop.f32.mrf.mxu0  ;;  %v1067_v44 = vmax.f32 %v1059_v61, %v1084_v50  ;;  %v1548_v61 = vadd.f32 %v1547_v62, %v1546_v56  ;;  %v554_v50 = vpop.permute.xlu0 %553  ;;  %v1026_v25 = vsel %vm1021_vm1, %v2450_v54, -inf  ;;  %v2609_v3 = vadd.s32 160, %v2377_v37 }
 0x100   : > { %v1490_v26 = vsel %vm1442_vm15, %v2562_v17, 0.0  ;;  %v1090_v24 = vsel %vm1021_vm1, %v2584_v21, -inf  ;;  %v1489_v43 = vsel %vm1441_vm2, %v2602_v55, 0.0  ;;  %vm1446_vm4 = vcmp.eq.s32.totalorder %v2580_v38, %v2387_v42  ;;  %v1856_v17 = vpop.f32.mrf.mxu1 }
 0x101   : > { %v1075_v18 = vmax.f32 %v1067_v44, %v1046_v20  ;;  %v897_v46 = vpop.f32.mrf.mxu0  ;;  %v1022_v44 = vsel %vm1021_vm1, %v2399_v57, -inf  ;;  %v2622_v2 = vadd.f32 %v894_v5, %v2361_v27  ;;  %vm1445_vm5 = vcmp.eq.s32.totalorder %v2588_v11, %v2387_v42 }
 0x102   : > { %v1032_v60 = vsel %vm1021_vm1, %v2476_v51, -inf  ;;  %v1034_v56 = vsel %vm1021_vm1, %v2490_v47, -inf  ;;  %v1549_v10 = vsel %vm1021_vm1, %v1489_v43, 0.0  ;;  %v1491_v27 = vsel %vm1443_vm0, %v2597_v40, 0.0 }
 0x103   : > { %v1083_v20 = vmax.f32 %v1075_v18, %v1094_v8  ;;  %v2631_v19 = vpop.f32.mrf.mxu0  ;;  %v1096_v5 = vsel %vm1021_vm1, %v2599_v6, -inf  ;;  %v1550_v18 = vadd.f32 %v1549_v10, %v1548_v61  ;;  %v2640_v8 = vadd.f32 %v977_v35, %v2546_v0  ;;  %v564_v35 = vpop.permute.xlu0 %563 }
 0x104   : > { %v1025_v62 = vsel %vm1021_vm1, %v2418_v7, -inf  ;;  %v1044_v47 = vsel %vm1021_vm1, %v2602_v55, -inf  ;;  %v2649_v51 = vadd.f32 %v2544_v16, %v2365_v29  ;;  %v1492_v0 = vsel %vm1444_vm3, %v2622_v2, 0.0  ;;  %v559_v16 = vpop.permute.xlu1 %558 }
 0x105   : > { %v1091_v14 = vmax.f32 %v1083_v20, %v1090_v24  ;;  %v1027_v20 = vmax.f32 %v1022_v44, %v1026_v25  ;;  %v1551_v24 = vsel %vm1021_vm1, %v1490_v26, 0.0  ;;  %v1033_v61 = vmax.f32 %v1025_v62, %v1032_v60  ;;  %v910_v26 = vpop.f32.mrf.mxu0 }
 0x106   : > { %v1552_v22 = vadd.f32 %v1551_v24, %v1550_v18  ;;  %v1553_v44 = vsel %vm1021_vm1, %v1491_v27, 0.0  ;;  %v2659_v18 = vadd.f32 %v1856_v17, %v564_v35  ;;  %v1040_v53 = vsel %vm1021_vm1, %v2530_v48, -inf }
 0x107   : > { %v1099_v43 = vmax.f32 %v1091_v14, %v1096_v5  ;;  %v1035_v10 = vmax.f32 %v1027_v20, %v1034_v56  ;;  %v1042_v14 = vsel %vm1021_vm1, %v2556_v49, -inf  ;;  %v1092_v5 = vsel %vm1021_vm1, %v2640_v8, -inf  ;;  %v990_v56 = vpop.f32.mrf.mxu1 }
 0x108   : > { %3094 = vst [vmem:[#allocation14_spill] sm:$0xff] %v2659_v18  ;;  %v1554_v29 = vadd.f32 %v1553_v44, %v1552_v22  ;;  %v1555_v60 = vsel %vm1021_vm1, %v1492_v0, 0.0  ;;  %v1054_v27 = vsel %vm1021_vm1, %v2649_v51, -inf  ;;  %v1050_v62 = vsel %vm1021_vm1, %v2622_v2, -inf  ;;  %v569_v38 = vpop.permute.xlu1 %568 }
 0x109   : > { %v1107_v25 = vmax.f32 %v1099_v43, %v1044_v47  ;;  %v2665_v47 = vadd.f32 %v897_v46, %v2363_v28  ;;  %v2673_v20 = vadd.f32 %v2568_v23, %v2367_v30  ;;  %v1043_v43 = vmax.f32 %v1035_v10, %v1042_v14  ;;  %v1837_v28 = vpop.f32.mrf.mxu0  ;;  %v1857_v14 = vpop.f32.mrf.mxu1 }
 0x10a   : > { %v1556_v17 = vadd.f32 %v1555_v60, %v1554_v29  ;;  %vm1447_vm6 = vcmp.eq.s32.totalorder %v2594_v39, %v2387_v42  ;;  %v1398_v0 = vadd.s32 176, %v2377_v37  ;;  %v1041_v46 = vmax.f32 %v1033_v61, %v1040_v53 }
 0x10b   : > { %v1065_v24 = vmax.f32 %v1092_v5, %v1107_v25  ;;  %v1048_v35 = vsel %vm1021_vm1, %v2597_v40, -inf  ;;  %v1102_v44 = vsel %vm1021_vm1, %v2659_v18, -inf  ;;  %v2682_v25 = vadd.f32 %v990_v56, %v554_v50  ;;  %v913_v56 = vpop.f32.mrf.mxu0 }
 0x10c   : > { %v1494_v30 = vsel %vm1446_vm4, %v2649_v51, 0.0  ;;  %v1051_v10 = vmax.f32 %v1043_v43, %v1050_v62  ;;  %v1493_v61 = vsel %vm1445_vm5, %v2665_v47, 0.0  ;;  %v1056_v5 = vsel %vm1021_vm1, %v2673_v20, -inf }
 0x10d   : > { %v1073_v22 = vmax.f32 %v1065_v24, %v1054_v27  ;;  %v1557_v29 = vsel %vm1021_vm1, %v1493_v61, 0.0  ;;  %vm1448_vm7 = vcmp.eq.s32.totalorder %v2609_v3, %v2387_v42  ;;  %v1397_v50 = vadd.s32 168, %v2377_v37 }
 0x10e   : > { %v1049_v53 = vmax.f32 %v1041_v46, %v1048_v35  ;;  %v1495_v60 = vsel %vm1447_vm6, %v2673_v20, 0.0  ;;  %v1558_v11 = vadd.f32 %v1557_v29, %v1556_v17  ;;  %v1559_v27 = vsel %vm1021_vm1, %v1494_v30, 0.0 }
 0x10f   : > { %v1081_v23 = vmax.f32 %v1073_v22, %v1102_v44  ;;  %v1098_v62 = vsel %vm1021_vm1, %v2682_v25, -inf  ;;  %v2705_v43 = vadd.f32 %v1857_v14, %v569_v38  ;;  %v2708_v22 = vadd.f32 %v910_v26, %v2369_v31  ;;  %v574_v44 = vpop.permute.xlu0 %573 }
 0x110   : > { %v1057_v35 = vmax.f32 %v1049_v53, %v1056_v5  ;;  %v1399_v39 = vadd.s32 184, %v2377_v37  ;;  %v1561_v17 = vsel %vm1021_vm1, %v1495_v60, 0.0  ;;  %v2714_v30 = vadd.f32 %v2631_v19, %v2373_v33 }
 0x111   : > { %v1089_v24 = vmax.f32 %v1081_v23, %v1051_v10  ;;  %v1560_v23 = vadd.f32 %v1559_v27, %v1558_v11  ;;  %v993_v10 = vpop.f32.mrf.mxu1  ;;  %v1496_v14 = vsel %vm1448_vm7, %v2708_v22, 0.0  ;;  %v2721_v31 = vadd.f32 %v913_v56, %v2371_v32 }
 0x112   : > { %vm1450_vm8 = vcmp.eq.s32.totalorder %v1398_v0, %v2387_v42  ;;  %vm1449_vm9 = vcmp.eq.s32.totalorder %v1397_v50, %v2387_v42  ;;  %v1104_v5 = vsel %vm1021_vm1, %v2705_v43, -inf  ;;  %v2727_v29 = vadd.f32 %v993_v10, %v559_v16 }
 0x113   : > { %v1097_v46 = vmax.f32 %v1089_v24, %v1098_v62  ;;  %v1562_v61 = vadd.f32 %v1561_v17, %v1560_v23  ;;  %v1563_v33 = vsel %vm1021_vm1, %v1496_v14, 0.0  ;;  %v2731_v19 = vadd.f32 %v1837_v28, %v2375_v34  ;;  %v1860_v38 = vpop.f32.mrf.mxu1  ;;  %v584_v34 = vpop.permute.xlu0 %583 }
 0x114   : > { %v1401_v3 = vadd.s32 200, %v2377_v37  ;;  %vm1451_vm10 = vcmp.eq.s32.totalorder %v1399_v39, %v2387_v42  ;;  %v1052_v0 = vsel %vm1021_vm1, %v2665_v47, -inf  ;;  %v1498_v50 = vsel %vm1450_vm8, %v2714_v30, 0.0 }
 0x115   : > { %v1105_v26 = vmax.f32 %v1097_v46, %v1057_v35  ;;  %v1564_v53 = vadd.f32 %v1563_v33, %v1562_v61  ;;  %v1497_v16 = vsel %vm1449_vm9, %v2721_v31, 0.0  ;;  %v1402_v24 = vadd.s32 208, %v2377_v37  ;;  %v579_v46 = vpop.permute.xlu1 %578  ;;  %v1006_v10 = vpop.f32.mrf.mxu1 }
 0x116   : > { %vm1452_vm11 = vcmp.eq.s32.totalorder %v2527_v36, %v2387_v42  ;;  %v1565_v60 = vsel %vm1021_vm1, %v1497_v16, 0.0  ;;  %v1100_v11 = vsel %vm1021_vm1, %v2727_v29, -inf  ;;  %v2745_v56 = vadd.f32 %v1860_v38, %v584_v34 }
 0x117   : > { %v1113_v32 = vmax.f32 %v1105_v26, %v1104_v5  ;;  %v1499_v27 = vsel %vm1451_vm10, %v2731_v19, 0.0  ;;  %v1566_v62 = vadd.f32 %v1565_v60, %v1564_v53  ;;  %v1403_v35 = vadd.s32 216, %v2377_v37  ;;  %v1861_v16 = vpop.f32.mrf.mxu1 }
 0x118   : > { %vm1453_vm12 = vcmp.eq.s32.totalorder %v1401_v3, %v2387_v42  ;;  %v1567_v36 = vsel %vm1021_vm1, %v1498_v50, 0.0  ;;  %v1500_v39 = vsel %vm1452_vm11, %v2401_v58, 0.0  ;;  %v1062_v17 = vsel %vm1021_vm1, %v2714_v30, -inf }
 0x119   : > { %v1115_v28 = vmax.f32 %v1052_v0, %v1113_v32  ;;  %v1568_v14 = vadd.f32 %v1567_v36, %v1566_v62  ;;  %vm1454_vm13 = vcmp.eq.s32.totalorder %v1402_v24, %v2387_v42  ;;  %v1404_v26 = vadd.s32 224, %v2377_v37 }
 0x11a   : > { %v1569_v5 = vsel %vm1021_vm1, %v1499_v27, 0.0  ;;  %v1501_v33 = vsel %vm1453_vm12, %v2423_v9, 0.0  ;;  %v1110_v3 = vsel %vm1021_vm1, %v2745_v56, -inf  ;;  %v2760_v32 = vadd.f32 %v1006_v10, %v574_v44 }
 0x11b   : > { %v1061_v23 = vmax.f32 %v1100_v11, %v1115_v28  ;;  %v1570_v38 = vadd.f32 %v1569_v5, %v1568_v14  ;;  %v1571_v53 = vsel %vm1021_vm1, %v1500_v39, 0.0  ;;  %vm1455_vm14 = vcmp.eq.s32.totalorder %v1403_v35, %v2387_v42  ;;  %v589_v11 = vpop.permute.xlu1 %588  ;;  %v1009_v14 = vpop.f32.mrf.mxu1 }
 0x11c   : > { %v1405_v0 = vadd.s32 232, %v2377_v37  ;;  %v1502_v24 = vsel %vm1454_vm13, %v2391_v45, 0.0  ;;  %v1058_v34 = vsel %vm1021_vm1, %v2708_v22, -inf  ;;  %v1573_v60 = vsel %vm1021_vm1, %v1501_v33, 0.0 }
 0x11d   : > { %v1069_v61 = vmax.f32 %v1061_v23, %v1062_v17  ;;  %v1572_v28 = vadd.f32 %v1571_v53, %v1570_v38  ;;  %v1406_v44 = vadd.s32 240, %v2377_v37  ;;  %vm1456_vm15 = vcmp.eq.s32.totalorder %v1404_v26, %v2387_v42 }
 0x11e   : > { %v1503_v62 = vsel %vm1455_vm14, %v2403_v59, 0.0  ;;  %v1106_v35 = vsel %vm1021_vm1, %v2760_v32, -inf  ;;  %v2774_v23 = vadd.f32 %v1861_v16, %v589_v11  ;;  %v1575_v10 = vsel %vm1021_vm1, %v1502_v24, 0.0 }
 0x11f   : > { %v1077_v50 = vmax.f32 %v1069_v61, %v1110_v3  ;;  %v1574_v36 = vadd.f32 %v1573_v60, %v1572_v28  ;;  %v1407_v39 = vadd.s32 248, %v2377_v37  ;;  %vm1457_vm0 = vcmp.eq.s32.totalorder %v1405_v0, %v2387_v42 }
 0x120   : > { %v1504_v61 = vsel %vm1456_vm15, %v2456_v1, 0.0  ;;  %v1064_v26 = vsel %vm1021_vm1, %v2731_v19, -inf  ;;  %v1577_v33 = vsel %vm1021_vm1, %v1503_v62, 0.0  ;;  %vm1458_vm2 = vcmp.eq.s32.totalorder %v1406_v44, %v2387_v42 }
 0x121   : > { %v1085_v27 = vmax.f32 %v1077_v50, %v1058_v34  ;;  %v1576_v5 = vadd.f32 %v1575_v10, %v1574_v36  ;;  %v1408_v3 = vadd.s32 256, %v2377_v37  ;;  %v1505_v53 = vsel %vm1457_vm0, %v2486_v63, 0.0 }
 0x122   : > { %v1112_v0 = vsel %vm1021_vm1, %v2774_v23, -inf  ;;  %v2788_v16 = vadd.f32 %v1009_v14, %v579_v46  ;;  %v1579_v24 = vsel %vm1021_vm1, %v1504_v61, 0.0  ;;  %vm1459_vm3 = vcmp.eq.s32.totalorder %v1407_v39, %v2387_v42 }
 0x123   : > { %v1093_v17 = vmax.f32 %v1085_v27, %v1106_v35  ;;  %v1578_v50 = vadd.f32 %v1577_v33, %v1576_v5  ;;  %v1506_v28 = vsel %vm1458_vm2, %v2446_v52, 0.0  ;;  %v1060_v60 = vsel %vm1021_vm1, %v2721_v31, -inf }
 0x124   : > { %v1581_v44 = vsel %vm1021_vm1, %v1505_v53, 0.0  ;;  %vm1460_vm4 = vcmp.eq.s32.totalorder %v1408_v3, %v2387_v42  ;;  %v1507_v62 = vsel %vm1459_vm3, %v2465_v13, 0.0  ;;  %v1409_v46 = vadd.s32 264, %v2377_v37 }
 0x125   : > { %v1101_v38 = vmax.f32 %v1093_v17, %v1064_v26  ;;  %v1580_v11 = vadd.f32 %v1579_v24, %v1578_v50  ;;  %v1108_v36 = vsel %vm1021_vm1, %v2788_v16, -inf  ;;  %v1583_v10 = vsel %vm1021_vm1, %v1506_v28, 0.0 }
 0x126   : > { %v1585_v14 = vsel %vm1021_vm1, %v1507_v62, 0.0  ;;  %v1508_v61 = vsel %vm1460_vm4, %v2513_v12, 0.0  ;;  %v1410_v5 = vadd.s32 272, %v2377_v37  ;;  %vm1461_vm5 = vcmp.eq.s32.totalorder %v1409_v46, %v2387_v42 }
 0x127   : > { %v1109_v34 = vmax.f32 %v1101_v38, %v1112_v0  ;;  %v1582_v35 = vadd.f32 %v1581_v44, %v1580_v11  ;;  %v1587_v38 = vsel %vm1021_vm1, %v1508_v61, 0.0  ;;  %vm249_vm6 = vcmask 122880  }
 0x128   : > { %v1509_v53 = vsel %vm1461_vm5, %v2551_v15, 0.0  ;;  %v3080_v24 = vmov 0.0   ;;  %vm1462_vm7 = vcmp.eq.s32.totalorder %v1410_v5, %v2387_v42 }
 0x129   : > { %v1114_v27 = vmax.f32 %v1060_v60, %v1109_v34  ;;  %v1584_v17 = vadd.f32 %v1583_v10, %v1582_v35  ;;  %250 = vst.msk [vmem:[#allocation2] sm:$0x1] %vm249_vm6, %v3080_v24  ;;  %v1411_v34 = vadd.s32 280, %v2377_v37  ;;  %v1589_v28 = vsel %vm1021_vm1, %v1509_v53, 0.0  ;;  %v3096_v53 = vld [vmem:[#allocation4_spill] sm:$0xff] }
 0x12a   : > { %v1510_v11 = vsel %vm1462_vm7, %v2503_v4, 0.0 }
 0x12b   : > { %v1116_v39 = vmax.f32 %v1114_v27, %v1108_v36  ;;  %v1586_v33 = vadd.f32 %v1585_v14, %v1584_v17  ;;  %vm1463_vm8 = vcmp.eq.s32.totalorder %v1411_v34, %v2387_v42  ;;  %v1412_v27 = vadd.s32 288, %v2377_v37 }
 0x12c   : > { %v1591_v62 = vsel %vm1021_vm1, %v1510_v11, 0.0  ;;  %v1511_v35 = vsel %vm1463_vm8, %v2523_v41, 0.0  ;;  %v1413_v36 = vadd.s32 296, %v2377_v37  ;;  %v3097_v11 = vld [vmem:[#allocation7_spill] sm:$0xff] }
 0x12d   : > { %v1117_v26 = vrot.slane %v1116_v39, 4  ;;  %v1588_v0 = vadd.f32 %v1587_v38, %v1586_v33  ;;  %vm1464_vm9 = vcmp.eq.s32.totalorder %v1412_v27, %v2387_v42 }
 0x12e   : > { %v1512_v14 = vsel %vm1464_vm9, %v2584_v21, 0.0  ;;  %vm1465_vm10 = vcmp.eq.s32.totalorder %v1413_v36, %v2387_v42  ;;  %v3098_v36 = vld [vmem:[#allocation6_spill] sm:$0xff] }
 0x12f   : > { %v1118_v3 = vmax.f32 %v1116_v39, %v1117_v26  ;;  %v1590_v44 = vadd.f32 %v1589_v28, %v1588_v0  ;;  %v1593_v39 = vsel %vm1021_vm1, %v1511_v35, 0.0  ;;  %v1595_v26 = vsel %vm1021_vm1, %v1512_v14, 0.0  ;;  %v3099_v14 = vld [vmem:[#allocation8_spill] sm:$0xff] }
 0x130   : > { %v1513_v5 = vsel %vm1465_vm10, %v2640_v8, 0.0 }
 0x131   : > { %v1119_v50 = vrot.slane %v1118_v3, 2  ;;  %v1592_v10 = vadd.f32 %v1591_v62, %v1590_v44 }
 0x133   : > { %v1120_v60 = vmax.f32 %v1118_v3, %v1119_v50  ;;  %v1594_v61 = vadd.f32 %v1593_v39, %v1592_v10  ;;  %v3095_v3 = vld [vmem:[#allocation5_spill] sm:$0xff]  ;;  %v1414_v39 = vadd.s32 304, %v2377_v37 }
 0x135   : > { %v1121_v46 = vrot.slane %v1120_v60, 1  ;;  %v1596_v34 = vadd.f32 %v1595_v26, %v1594_v61  ;;  %vm1466_vm11 = vcmp.eq.s32.totalorder %v1414_v39, %v2387_v42 }
 0x137   : > { %v2821_v17 = vmax.f32 %v1120_v60, %v1121_v46  ;;  %v1597_v60 = vsel %vm1021_vm1, %v1513_v5, 0.0  ;;  %v3100_v5 = vld [vmem:[#allocation9_spill] sm:$0xff] }
 0x138   : > { %v1598_v35 = vadd.f32 %v1597_v60, %v1596_v34  ;;  %v1419_v60 = vadd.s32 344, %v2377_v37 }
 0x139   : > { %v1123_v33 = vsub.f32 %v2399_v57, %v2821_v17  ;;  %v1124_v38 = vsub.f32 %v3095_v3, %v2821_v17  ;;  %v1125_v0 = vsub.f32 %v3096_v53, %v2821_v17  ;;  %v1126_v50 = vsub.f32 %v2418_v7, %v2821_v17 }
 0x13a   : > { %v1127_v28 = vsub.f32 %v2450_v54, %v2821_v17  ;;  %v1128_v44 = vsub.f32 %v3097_v11, %v2821_v17  ;;  %v1129_v10 = vsub.f32 %v3098_v36, %v2821_v17  ;;  %v1415_v54 = vadd.s32 312, %v2377_v37 }
 0x13b   : > { %v1171_v27 = vmul.f32 1.442695, %v1123_v33  ;;  %v1173_v57 = vmul.f32 1.442695, %v1124_v38  ;;  %v1175_v62 = vmul.f32 1.442695, %v1125_v0  ;;  %v1130_v61 = vsub.f32 %v3099_v14, %v2821_v17 }
 0x13c   : > { %v1177_v46 = vmul.f32 1.442695, %v1126_v50  ;;  %v1179_v7 = vmul.f32 1.442695, %v1127_v28  ;;  %v1181_v26 = vmul.f32 1.442695, %v1128_v44  ;;  %v1131_v33 = vsub.f32 %v3100_v5, %v2821_v17 }
 0x13d   : > { %1920 = vpow2.f32 %v1171_v27  ;;  %v1183_v3 = vmul.f32 1.442695, %v1129_v10  ;;  %v1418_v38 = vadd.s32 336, %v2377_v37  ;;  %v1416_v53 = vadd.s32 320, %v2377_v37  ;;  %v3101_v50 = vld [vmem:[#allocation11_spill] sm:$0xff] }
 0x13e   : > { %1922 = vpow2.f32 %v1173_v57  ;;  %v1417_v0 = vadd.s32 328, %v2377_v37  ;;  %vm1467_vm12 = vcmp.eq.s32.totalorder %v1415_v54, %v2387_v42  ;;  %v1132_v34 = vsub.f32 %v3101_v50, %v2821_v17  ;;  %v3102_v57 = vld [vmem:[#allocation13_spill] sm:$0xff] }
 0x13f   : > { %1924 = vpow2.f32 %v1175_v62  ;;  %v1185_v28 = vmul.f32 1.442695, %v1130_v61  ;;  %v2857_v11 = vadd.s32 368, %v2377_v37  ;;  %v1420_v44 = vadd.s32 352, %v2377_v37 }
 0x140   : > { %1926 = vpow2.f32 %v1177_v46  ;;  %v2861_v27 = vadd.s32 360, %v2377_v37  ;;  %v1514_v62 = vsel %vm1466_vm11, %v3102_v57, 0.0  ;;  %v3103_v46 = vld [vmem:[#allocation10_spill] sm:$0xff]  ;;  %v1187_v10 = vmul.f32 1.442695, %v1131_v33 }
 0x141   : > { %1928 = vpow2.f32 %v1179_v7  ;;  %v1133_v36 = vsub.f32 %v3103_v46, %v2821_v17  ;;  %vm1470_vm13 = vcmp.eq.s32.totalorder %v1418_v38, %v2387_v42  ;;  %vm1468_vm14 = vcmp.eq.s32.totalorder %v1416_v53, %v2387_v42 }
 0x142   : > { %1930 = vpow2.f32 %v1181_v26  ;;  %vm1469_vm15 = vcmp.eq.s32.totalorder %v1417_v0, %v2387_v42  ;;  %v2870_v7 = vadd.s32 376, %v2377_v37  ;;  %v1515_v39 = vsel %vm1467_vm12, %v2599_v6, 0.0 }
 0x143   : > { %1932 = vpow2.f32 %v1183_v3  ;;  %v1134_v14 = vsub.f32 %v2530_v48, %v2821_v17  ;;  %v1189_v61 = vmul.f32 1.442695, %v1132_v34  ;;  %v1599_v26 = vsel %vm1021_vm1, %v1514_v62, 0.0 }
 0x144   : > { %1934 = vpow2.f32 %v1185_v28  ;;  %vm1471_vm0 = vcmp.eq.s32.totalorder %v1419_v60, %v2387_v42  ;;  %vm1472_vm2 = vcmp.eq.s32.totalorder %v1420_v44, %v2387_v42  ;;  %vm1473_vm3 = vcmp.eq.s32.totalorder %v2861_v27, %v2387_v42 }
 0x145   : > { %v1516_v33 = vsel %vm1468_vm14, %v2682_v25, 0.0  ;;  %vm1474_vm4 = vcmp.eq.s32.totalorder %v2857_v11, %v2387_v42  ;;  %v1135_v48 = vsub.f32 %v2556_v49, %v2821_v17  ;;  %1936 = vpow2.f32 %v1187_v10 }
 0x146   : > { %v1191_v54 = vmul.f32 1.442695, %v1133_v36  ;;  %v1601_v53 = vsel %vm1021_vm1, %v1515_v39, 0.0  ;;  %v1517_v50 = vsel %vm1469_vm15, %v2727_v29, 0.0  ;;  %v1600_v28 = vadd.f32 %v1599_v26, %v1598_v35  ;;  %v3104_v26 = vld [vmem:[#allocation12_spill] sm:$0xff] }
 0x147   : > { %vm1475_vm5 = vcmp.eq.s32.totalorder %v2870_v7, %v2387_v42  ;;  %v1136_v46 = vsub.f32 %v2602_v55, %v2821_v17  ;;  %1938 = vpow2.f32 %v1189_v61  ;;  %v1193_v49 = vmul.f32 1.442695, %v1134_v14 }
 0x148   : > { %v1518_v0 = vsel %vm1470_vm13, %v2659_v18, 0.0  ;;  %v1603_v39 = vsel %vm1021_vm1, %v1516_v33, 0.0  ;;  %v1602_v35 = vadd.f32 %v1601_v53, %v1600_v28  ;;  %v1137_v24 = vsub.f32 %v3104_v26, %v2821_v17 }
 0x149   : > { %1940 = vpow2.f32 %v1191_v54  ;;  %v1195_v37 = vmul.f32 1.442695, %v1135_v48  ;;  %v1519_v14 = vsel %vm1471_vm0, %v2705_v43, 0.0  ;;  %v1138_v33 = vsub.f32 %v2597_v40, %v2821_v17 }
 0x14a   : > { %v1921_v5 = vpop.eup %1920  ;;  %v1604_v18 = vadd.f32 %v1603_v39, %v1602_v35  ;;  %1942 = vpow2.f32 %v1193_v49  ;;  %v1197_v53 = vmul.f32 1.442695, %v1136_v46  ;;  %v1607_v48 = vsel %vm1021_vm1, %v1518_v0, 0.0 }
 0x14b   : > { %v1923_v3 = vpop.eup %1922  ;;  %v1267_v34 = vsel %vm1021_vm1, %v1921_v5, 0.0  ;;  %v1520_v28 = vsel %vm1472_vm2, %v2760_v32, 0.0  ;;  %1944 = vpow2.f32 %v1195_v37  ;;  %v1609_v46 = vsel %vm1021_vm1, %v1519_v14, 0.0 }
 0x14c   : > { %v1925_v62 = vpop.eup %1924  ;;  %v1268_v36 = vsel %vm1021_vm1, %v1923_v3, 0.0  ;;  %v1605_v3 = vsel %vm1021_vm1, %v1517_v50, 0.0  ;;  %v1139_v50 = vsub.f32 %v2622_v2, %v2821_v17  ;;  %v1521_v0 = vsel %vm1473_vm3, %v2788_v16, 0.0 }
 0x14d   : > { %v1927_v10 = vpop.eup %1926  ;;  %v1269_v5 = vadd.f32 %v1268_v36, %v1267_v34  ;;  %v1270_v55 = vsel %vm1021_vm1, %v1925_v62, 0.0  ;;  %v1606_v62 = vadd.f32 %v1605_v3, %v1604_v18  ;;  %v1199_v36 = vmul.f32 1.442695, %v1137_v24 }
 0x14e   : > { %v1929_v61 = vpop.eup %1928  ;;  %v1272_v34 = vsel %vm1021_vm1, %v1927_v10, 0.0  ;;  %v1140_v18 = vsub.f32 %v2665_v47, %v2821_v17  ;;  %1946 = vpow2.f32 %v1197_v53  ;;  %v1201_v39 = vmul.f32 1.442695, %v1138_v33 }
 0x14f   : > { %v1271_v38 = vadd.f32 %v1270_v55, %v1269_v5  ;;  %v1931_v54 = vpop.eup %1930  ;;  %v1274_v40 = vsel %vm1021_vm1, %v1929_v61, 0.0  ;;  %v1608_v44 = vadd.f32 %v1607_v48, %v1606_v62  ;;  %v1522_v24 = vsel %vm1474_vm4, %v2745_v56, 0.0 }
 0x150   : > { %v1933_v49 = vpop.eup %1932  ;;  %v1276_v37 = vsel %vm1021_vm1, %v1931_v54, 0.0  ;;  %v1611_v5 = vsel %vm1021_vm1, %v1520_v28, 0.0  ;;  %v1141_v27 = vsub.f32 %v2649_v51, %v2821_v17  ;;  %1948 = vpow2.f32 %v1199_v36 }
 0x151   : > { %v1273_v60 = vadd.f32 %v1272_v34, %v1271_v38  ;;  %v1935_v2 = vpop.eup %1934  ;;  %v1610_v26 = vadd.f32 %v1609_v46, %v1608_v44  ;;  %v1203_v55 = vmul.f32 1.442695, %v1139_v50  ;;  %v1278_v47 = vsel %vm1021_vm1, %v1933_v49, 0.0 }
 0x152   : > { %v1937_v61 = vpop.eup %1936  ;;  %v1523_v14 = vsel %vm1475_vm5, %v2774_v23, 0.0  ;;  %v1613_v38 = vsel %vm1021_vm1, %v1521_v0, 0.0  ;;  %v1142_v33 = vsub.f32 %v2673_v20, %v2821_v17  ;;  %1950 = vpow2.f32 %v1201_v39 }
 0x153   : > { %v1275_v10 = vadd.f32 %v1274_v40, %v1273_v60  ;;  %v1612_v11 = vadd.f32 %v1611_v5, %v1610_v26  ;;  %v1205_v53 = vmul.f32 1.442695, %v1140_v18  ;;  %v1280_v51 = vsel %vm1021_vm1, %v1935_v2, 0.0 }
 0x154   : > { %v1939_v34 = vpop.eup %1938  ;;  %v1615_v54 = vsel %vm1021_vm1, %v1522_v24, 0.0  ;;  %v1143_v42 = vsub.f32 %v2708_v22, %v2821_v17  ;;  %1952 = vpow2.f32 %v1203_v55  ;;  %v1207_v7 = vmul.f32 1.442695, %v1141_v27 }
 0x155   : > { %v1277_v35 = vadd.f32 %v1276_v37, %v1275_v10  ;;  %v1614_v28 = vadd.f32 %v1613_v38, %v1612_v11  ;;  %v1282_v60 = vsel %vm1021_vm1, %v1937_v61, 0.0  ;;  %v1617_v50 = vsel %vm1021_vm1, %v1523_v14, 0.0 }
 0x156   : > { %v1941_v62 = vpop.eup %1940  ;;  %v1144_v40 = vsub.f32 %v2721_v31, %v2821_v17  ;;  %1954 = vpow2.f32 %v1205_v53  ;;  %v1209_v49 = vmul.f32 1.442695, %v1142_v33  ;;  %v1284_v46 = vsel %vm1021_vm1, %v1939_v34, 0.0 }
 0x157   : > { %v1279_v3 = vadd.f32 %v1278_v47, %v1277_v35  ;;  %v1616_v36 = vadd.f32 %v1615_v54, %v1614_v28  ;;  %v1943_v10 = vpop.eup %1942  ;;  %v1145_v22 = vsub.f32 %v2714_v30, %v2821_v17  ;;  %1956 = vpow2.f32 %v1207_v7 }
 0x158   : > { %v1211_v18 = vmul.f32 1.442695, %v1143_v42  ;;  %v1286_v39 = vsel %vm1021_vm1, %v1941_v62, 0.0  ;;  %v1945_v37 = vpop.eup %1944  ;;  %v1146_v31 = vsub.f32 %v2731_v19, %v2821_v17  ;;  %1958 = vpow2.f32 %v1209_v49 }
 0x159   : > { %v1281_v48 = vadd.f32 %v1280_v51, %v1279_v3  ;;  %v2950_v44 = vadd.f32 %v1617_v50, %v1616_v36  ;;  %v1213_v24 = vmul.f32 1.442695, %v1144_v40  ;;  %v1288_v5 = vsel %vm1021_vm1, %v1943_v10, 0.0 }
 0x15a   : > { %v1147_v27 = vsub.f32 %v2401_v58, %v2821_v17  ;;  %1960 = vpow2.f32 %v1211_v18  ;;  %v1215_v30 = vmul.f32 1.442695, %v1145_v22  ;;  %v1290_v55 = vsel %vm1021_vm1, %v1945_v37, 0.0 }
 0x15b   : > { %v1283_v20 = vadd.f32 %v1282_v60, %v1281_v48  ;;  %v1947_v35 = vpop.eup %1946  ;;  %v1148_v14 = vsub.f32 %v2423_v9, %v2821_v17  ;;  %1962 = vpow2.f32 %v1213_v24  ;;  %v1217_v19 = vmul.f32 1.442695, %v1146_v31 }
 0x15c   : > { %v1292_v3 = vsel %vm1021_vm1, %v1947_v35, 0.0  ;;  %v1149_v33 = vsub.f32 %v2391_v45, %v2821_v17  ;;  %1964 = vpow2.f32 %v1215_v30  ;;  %v1219_v58 = vmul.f32 1.442695, %v1147_v27 }
 0x15d   : > { %v1285_v0 = vadd.f32 %v1284_v46, %v1283_v20  ;;  %v1949_v47 = vpop.eup %1948  ;;  %v1150_v54 = vsub.f32 %v2403_v59, %v2821_v17  ;;  %1966 = vpow2.f32 %v1217_v19  ;;  %v1221_v9 = vmul.f32 1.442695, %v1148_v14 }
 0x15e   : > { %v1294_v53 = vsel %vm1021_vm1, %v1949_v47, 0.0  ;;  %v1151_v7 = vsub.f32 %v2456_v1, %v2821_v17  ;;  %1968 = vpow2.f32 %v1219_v58  ;;  %v1223_v45 = vmul.f32 1.442695, %v1149_v33 }
 0x15f   : > { %v1287_v2 = vadd.f32 %v1286_v39, %v1285_v0  ;;  %v1951_v11 = vpop.eup %1950  ;;  %v1152_v20 = vsub.f32 %v2486_v63, %v2821_v17  ;;  %1970 = vpow2.f32 %v1221_v9  ;;  %v1225_v59 = vmul.f32 1.442695, %v1150_v54 }
 0x160   : > { %v1296_v48 = vsel %vm1021_vm1, %v1951_v11, 0.0  ;;  %v1153_v46 = vsub.f32 %v2446_v52, %v2821_v17  ;;  %1972 = vpow2.f32 %v1223_v45  ;;  %v1227_v1 = vmul.f32 1.442695, %v1151_v7 }
 0x161   : > { %v1289_v26 = vadd.f32 %v1288_v5, %v1287_v2  ;;  %v1953_v51 = vpop.eup %1952  ;;  %v1154_v18 = vsub.f32 %v2465_v13, %v2821_v17  ;;  %1974 = vpow2.f32 %v1225_v59  ;;  %v1229_v63 = vmul.f32 1.442695, %v1152_v20 }
 0x162   : > { %v1298_v60 = vsel %vm1021_vm1, %v1953_v51, 0.0  ;;  %v1155_v31 = vsub.f32 %v2513_v12, %v2821_v17  ;;  %1976 = vpow2.f32 %v1227_v1  ;;  %v1231_v52 = vmul.f32 1.442695, %v1153_v46 }
 0x163   : > { %v1291_v61 = vadd.f32 %v1290_v55, %v1289_v26  ;;  %v1955_v28 = vpop.eup %1954  ;;  %v1156_v26 = vsub.f32 %v2551_v15, %v2821_v17  ;;  %1978 = vpow2.f32 %v1229_v63  ;;  %v1233_v13 = vmul.f32 1.442695, %v1154_v18  ;;  %v3105_v18 = vld [vmem:[#allocation14_spill] sm:$0xff] }
 0x164   : > { %v1957_v62 = vpop.eup %1956  ;;  %v1300_v36 = vsel %vm1021_vm1, %v1955_v28, 0.0  ;;  %v1157_v47 = vsub.f32 %v2503_v4, %v2821_v17  ;;  %1980 = vpow2.f32 %v1231_v52  ;;  %v1235_v12 = vmul.f32 1.442695, %v1155_v31 }
 0x165   : > { %v1293_v38 = vadd.f32 %v1292_v3, %v1291_v61  ;;  %v1959_v40 = vpop.eup %1958  ;;  %v1302_v10 = vsel %vm1021_vm1, %v1957_v62, 0.0  ;;  %v1158_v3 = vsub.f32 %v2523_v41, %v2821_v17  ;;  %1982 = vpow2.f32 %v1233_v13 }
 0x166   : > { %v1304_v39 = vsel %vm1021_vm1, %v1959_v40, 0.0  ;;  %v1237_v15 = vmul.f32 1.442695, %v1156_v26  ;;  %v1159_v58 = vsub.f32 %v2584_v21, %v2821_v17  ;;  %1984 = vpow2.f32 %v1235_v12 }
 0x167   : > { %v1295_v34 = vadd.f32 %v1294_v53, %v1293_v38  ;;  %v1961_v0 = vpop.eup %1960  ;;  %v1239_v4 = vmul.f32 1.442695, %v1157_v47  ;;  %v1160_v54 = vsub.f32 %v2640_v8, %v2821_v17  ;;  %v1241_v41 = vmul.f32 1.442695, %v1158_v3 }
 0x168   : > { %v1963_v37 = vpop.eup %1962  ;;  %v1306_v24 = vsel %vm1021_vm1, %v1961_v0, 0.0  ;;  %1986 = vpow2.f32 %v1237_v15  ;;  %v1243_v21 = vmul.f32 1.442695, %v1159_v58  ;;  %v1162_v62 = vsub.f32 %v2599_v6, %v2821_v17 }
 0x169   : > { %v1297_v42 = vadd.f32 %v1296_v48, %v1295_v34  ;;  %v1965_v5 = vpop.eup %1964  ;;  %v1308_v27 = vsel %vm1021_vm1, %v1963_v37, 0.0  ;;  %1988 = vpow2.f32 %v1239_v4  ;;  %v1245_v8 = vmul.f32 1.442695, %v1160_v54 }
 0x16a   : > { %v1967_v30 = vpop.eup %1966  ;;  %v1310_v61 = vsel %vm1021_vm1, %v1965_v5, 0.0  ;;  %1990 = vpow2.f32 %v1241_v41  ;;  %v1164_v1 = vsub.f32 %v2727_v29, %v2821_v17  ;;  %v1249_v6 = vmul.f32 1.442695, %v1162_v62 }
 0x16b   : > { %v1299_v50 = vadd.f32 %v1298_v60, %v1297_v42  ;;  %v1969_v14 = vpop.eup %1968  ;;  %v1312_v11 = vsel %vm1021_vm1, %v1967_v30, 0.0  ;;  %v1161_v42 = vsub.f32 %v3102_v57, %v2821_v17  ;;  %1992 = vpow2.f32 %v1243_v21 }
 0x16c   : > { %v1971_v38 = vpop.eup %1970  ;;  %v1314_v53 = vsel %vm1021_vm1, %v1969_v14, 0.0  ;;  %1994 = vpow2.f32 %v1245_v8  ;;  %v1165_v63 = vsub.f32 %v3105_v18, %v2821_v17  ;;  %v1166_v31 = vsub.f32 %v2705_v43, %v2821_v17 }
 0x16d   : > { %v1301_v49 = vadd.f32 %v1300_v36, %v1299_v50  ;;  %v1973_v51 = vpop.eup %1972  ;;  %v1316_v9 = vsel %vm1021_vm1, %v1971_v38, 0.0  ;;  %v1163_v36 = vsub.f32 %v2682_v25, %v2821_v17  ;;  %v1247_v57 = vmul.f32 1.442695, %v1161_v42 }
 0x16e   : > { %v1975_v48 = vpop.eup %1974  ;;  %v1318_v7 = vsel %vm1021_vm1, %v1973_v51, 0.0  ;;  %v1253_v29 = vmul.f32 1.442695, %v1164_v1  ;;  %v1255_v26 = vmul.f32 1.442695, %v1165_v63  ;;  %v1169_v14 = vsub.f32 %v2745_v56, %v2821_v17 }
 0x16f   : > { %v1303_v22 = vadd.f32 %v1302_v10, %v1301_v49  ;;  %v1977_v45 = vpop.eup %1976  ;;  %v1320_v50 = vsel %vm1021_vm1, %v1975_v48, 0.0  ;;  %1996 = vpow2.f32 %v1247_v57  ;;  %v1251_v25 = vmul.f32 1.442695, %v1163_v36 }
 0x170   : > { %v1979_v20 = vpop.eup %1978  ;;  %v1322_v40 = vsel %vm1021_vm1, %v1977_v45, 0.0  ;;  %1998 = vpow2.f32 %v1249_v6  ;;  %v1257_v43 = vmul.f32 1.442695, %v1166_v31  ;;  %v1263_v4 = vmul.f32 1.442695, %v1169_v14 }
 0x171   : > { %v1305_v2 = vadd.f32 %v1304_v39, %v1303_v22  ;;  %v1981_v49 = vpop.eup %1980  ;;  %v1324_v10 = vsel %vm1021_vm1, %v1979_v20, 0.0  ;;  %2000 = vpow2.f32 %v1251_v25  ;;  %v3106_v14 = vmov 0.0  }
 0x172   : > { %v1983_v0 = vpop.eup %1982  ;;  %v1326_v39 = vsel %vm1021_vm1, %v1981_v49, 0.0  ;;  %2002 = vpow2.f32 %v1253_v29 }
 0x173   : > { %v1307_v35 = vadd.f32 %v1306_v24, %v1305_v2  ;;  %v1985_v37 = vpop.eup %1984  ;;  %v1328_v52 = vsel %vm1021_vm1, %v1983_v0, 0.0  ;;  %2004 = vpow2.f32 %v1255_v26 }
 0x174   : > { %v1330_v13 = vsel %vm1021_vm1, %v1985_v37, 0.0  ;;  %2006 = vpow2.f32 %v1257_v43 }
 0x175   : > { %v1309_v55 = vadd.f32 %v1308_v27, %v1307_v35  ;;  %v1987_v24 = vpop.eup %1986  ;;  %v1167_v35 = vsub.f32 %v2760_v32, %v2821_v17 }
 0x176   : > { %v1989_v27 = vpop.eup %1988  ;;  %v1332_v47 = vsel %vm1021_vm1, %v1987_v24, 0.0  ;;  %v1619_v24 = vrot.slane %v2950_v44, 4 }
 0x177   : > { %v1311_v19 = vadd.f32 %v1310_v61, %v1309_v55  ;;  %v1168_v55 = vsub.f32 %v2788_v16, %v2821_v17  ;;  %v1991_v12 = vpop.eup %1990  ;;  %v1259_v32 = vmul.f32 1.442695, %v1167_v35  ;;  %v1170_v16 = vsub.f32 %v2774_v23, %v2821_v17 }
 0x178   : > { %v1993_v3 = vpop.eup %1992  ;;  %v1336_v38 = vsel %vm1021_vm1, %v1991_v12, 0.0  ;;  %v1620_v26 = vadd.f32 %v1619_v24, %v2950_v44 }
 0x179   : > { %v1313_v33 = vadd.f32 %v1312_v11, %v1311_v19  ;;  %v1334_v19 = vsel %vm1021_vm1, %v1989_v27, 0.0  ;;  %v1261_v11 = vmul.f32 1.442695, %v1168_v55  ;;  %2008 = vpow2.f32 %v1259_v32 }
 0x17a   : > { %v1265_v54 = vmul.f32 1.442695, %v1170_v16 }
 0x17b   : > { %v1315_v34 = vadd.f32 %v1314_v53, %v1313_v33  ;;  %v1995_v33 = vpop.eup %1994  ;;  %v1338_v53 = vsel %vm1021_vm1, %v1993_v3, 0.0  ;;  %2010 = vpow2.f32 %v1261_v11  ;;  %v1625_v3 = vld [vmem:[#allocation2] sm:$0x1] }
 0x17c   : > { %v1997_v56 = vpop.eup %1996  ;;  %2012 = vpow2.f32 %v1263_v4 }
 0x17d   : > { %v1317_v28 = vadd.f32 %v1316_v9, %v1315_v34  ;;  %v1340_v34 = vsel %vm1021_vm1, %v1995_v33, 0.0  ;;  %v1999_v41 = vpop.eup %1998  ;;  %v1342_v48 = vsel %vm1021_vm1, %v1997_v56, 0.0  ;;  %2014 = vpow2.f32 %v1265_v54 }
 0x17e   : > { %v1344_v23 = vsel %vm1021_vm1, %v1999_v41, 0.0 }
 0x17f   : > { %v1319_v60 = vadd.f32 %v1318_v7, %v1317_v28  ;;  %v2001_v28 = vpop.eup %2000 }
 0x180   : > { %v2003_v21 = vpop.eup %2002  ;;  %v1346_v45 = vsel %vm1021_vm1, %v2001_v28, 0.0 }
 0x181   : > { %v1321_v59 = vadd.f32 %v1320_v50, %v1319_v60  ;;  %v2005_v60 = vpop.eup %2004  ;;  %v1348_v8 = vsel %vm1021_vm1, %v2003_v21, 0.0 }
 0x182   : > { %v2007_v50 = vpop.eup %2006 }
 0x183   : > { %v1323_v46 = vadd.f32 %v1322_v40, %v1321_v59  ;;  %v1350_v59 = vsel %vm1021_vm1, %v2005_v60, 0.0  ;;  %v1352_v40 = vsel %vm1021_vm1, %v2007_v50, 0.0 }
 0x185   : > { %v1325_v22 = vadd.f32 %v1324_v10, %v1323_v46 }
 0x186   : > { %v2009_v36 = vpop.eup %2008 }
 0x187   : > { %v1327_v2 = vadd.f32 %v1326_v39, %v1325_v22  ;;  %v1354_v1 = vsel %vm1021_vm1, %v2009_v36, 0.0 }
 0x188   : > { %v2011_v49 = vpop.eup %2010 }
 0x189   : > { %v1329_v5 = vadd.f32 %v1328_v52, %v1327_v2  ;;  %v2013_v6 = vpop.eup %2012  ;;  %v1356_v0 = vsel %vm1021_vm1, %v2011_v49, 0.0 }
 0x18a   : > { %v2015_v22 = vpop.eup %2014  ;;  %v1358_v63 = vsel %vm1021_vm1, %v2013_v6, 0.0 }
 0x18b   : > { %v1331_v30 = vadd.f32 %v1330_v13, %v1329_v5  ;;  %v1360_v39 = vsel %vm1021_vm1, %v2015_v22, 0.0  ;;  %v1621_v13 = vrot.slane %v1620_v26, 2 }
 0x18d   : > { %v1333_v61 = vadd.f32 %v1332_v47, %v1331_v30  ;;  %v1622_v27 = vadd.f32 %v1621_v13, %v1620_v26  ;;  %v2018_v47 = vld [vmem:[%s2383_s11] sm:$0x1] }
 0x18e   : > { %vm1372_vm1 = vcmp.ge.s32.totalorder %v2018_v47, 0 }
 0x18f   : > { %v1335_v15 = vadd.f32 %v1334_v19, %v1333_v61  ;;  %v1623_v30 = vrot.slane %v1622_v27, 1  ;;  %v1780_v32 = vsel %vm1372_vm1, 1.0, %v3106_v14 }
 0x191   : > { %v1337_v58 = vadd.f32 %v1336_v38, %v1335_v15  ;;  %v1624_v61 = vadd.f32 %v1623_v30, %v1622_v27 }
 0x193   : > { %v1339_v51 = vadd.f32 %v1338_v53, %v1337_v58 }
 0x195   : > { %v1341_v9 = vadd.f32 %v1340_v34, %v1339_v51 }
 0x197   : > { %v1343_v42 = vadd.f32 %v1342_v48, %v1341_v9 }
 0x199   : > { %v1345_v7 = vadd.f32 %v1344_v23, %v1343_v42 }
 0x19b   : > { %v1347_v62 = vadd.f32 %v1346_v45, %v1345_v7 }
 0x19d   : > { %v1349_v20 = vadd.f32 %v1348_v8, %v1347_v62 }
 0x19f   : > { %v1351_v57 = vadd.f32 %v1350_v59, %v1349_v20 }
 0x1a1   : > { %v1353_v46 = vadd.f32 %v1352_v40, %v1351_v57 }
 0x1a3   : > { %v1355_v10 = vadd.f32 %v1354_v1, %v1353_v46 }
 0x1a5   : > { %v1357_v18 = vadd.f32 %v1356_v0, %v1355_v10 }
 0x1a7   : > { %v1359_v25 = vadd.f32 %v1358_v63, %v1357_v18 }
 0x1a9   : > { %v1361_v37 = vadd.f32 %v1360_v39, %v1359_v25 }
 0x1ab   : > { %v1362_v2 = vrot.slane %v1361_v37, 4 }
 0x1ad   : > { %v1363_v31 = vadd.f32 %v1362_v2, %v1361_v37 }
 0x1af   : > { %v1364_v29 = vrot.slane %v1363_v31, 2 }
 0x1b1   : > { %v1365_v52 = vadd.f32 %v1364_v29, %v1363_v31 }
 0x1b3   : > { %v1366_v5 = vrot.slane %v1365_v52, 1 }
 0x1b5   : > { %v1367_v35 = vadd.f32 %v1366_v5, %v1365_v52 }
 0x1b7   : > { %2016 = vlog2.f32 %v1367_v35 }
 0x1c4   : > { %v2017_v55 = vpop.eup %2016 }
 0x1c5   : > { %v1369_v43 = vmul.f32 0.6931472, %v2017_v55 }
 0x1c7   : > { %v1370_v12 = vadd.f32 %v1369_v43, %v2821_v17  ;;  %v3107_v17 = vld [vmem:[#allocation3_spill] sm:$0xff] }
 0x1c8   : > { %v3108_v33 = vsub.s32 0, %v3107_v17 }
 0x1c9   : > { %v1626_v19 = vsub.f32 %v1370_v12, %v1624_v61 }
 0x1cb   : > { %v1627_v15 = vmul.f32 %v1780_v32, %v1626_v19 }
 0x1cd   : > { %v1628_v11 = vadd.f32 %v1627_v15, %v1625_v3 }
 0x1cf   : > { %1630 = vst.msk [vmem:[#allocation2] sm:$0x1] %vm249_vm6, %v1628_v11 }
 0x1d6   : > { %v1634_v44 = vld [vmem:[#allocation2] sm:$0x1] }
 0x1d7   : > { %v1635_v38 = vsel %vm249_vm6, %v1634_v44, 0.0 }
 0x1d8   : > { %1636 = vadd.xlane.f32.xlu0 %v1635_v38 }
 0x261   : > { %v1637_v16 = vpop.xlane.xlu0 %1636 }
 0x262   : > { %v1641_v58 = vrot.slane %v1637_v16, %v3108_v33 }
 0x264   : > { %1642 = vst [vmem:[%s243_s19] sm:$0xff] %v1641_v58 }
 0x265 PF: > { %s14_s17 = sadd.s32 1, %s2042_s17   ;;  %s3109_s15 = smov %s2038_s16 }
 0x266   : > { %p11_p5 = scmp.ge.s32.totalorder %s14_s17, 4   ;;  %s3110_s16 = smov %s3112_s18 }
 0x268   :  { %13 = sbr.rel (!%p11_p5) target bundleno = 2 (0x2), region = 77 }

</bundles_post_ra>
